<compile_context>
chip_gen: v7x
topology: tpu7x:2x2x1
jax: 0.10.0
libtpu: 0.0.40
codegen_flags: <defaults>
</compile_context>

<pallas_src>
import math

import jax
import jax.numpy as jnp
from jax import lax
from jax.experimental import pallas as pl
from jax.experimental.pallas import tpu as pltpu

EMBED = 50
HIDDEN = 64
NUM_CLASSES = 4
_HH = 2 * HIDDEN          # 128 fused hidden lanes [h1 | h2]
_G = 4 * _HH              # 512 fused gate lanes  [i1|i2, f1|f2, g1|g2, o1|o2]
_KIN = 128                # padded input-projection contraction dim (2*EMBED -> 128)


# ----------------------------------------------------------------------------- kernel
def out2_kernel(ids_ref, slen_ref, gat_ref, wih_ref, whh_ref, b_ref,
                wl1_ref, bl1_ref, wl_ref, bl_ref, out_ref, xw_ref):
    TB = ids_ref.shape[0]          # T * Bp (time-major flattened tokens)
    T, Bp, _ = xw_ref.shape
    V2 = gat_ref.shape[0]          # 2 * vocab_pad

    # (1) In-kernel embedding gather as a two-hot MXU matmul (one hot per sentence):
    #     table row v holds emb[v] in lanes [0:50] (sentence1 block) and row
    #     vocab_pad+v holds emb[v] in lanes [50:100] (sentence2 block).
    iota_v = lax.broadcasted_iota(jnp.int32, (TB, V2), 1)
    hit = (iota_v == ids_ref[:, 0:1]) | (iota_v == ids_ref[:, 1:2])
    twohot = jnp.where(hit, 1.0, 0.0).astype(jnp.bfloat16)              # (TB, V2)
    e = jnp.dot(twohot, gat_ref[...],
                preferred_element_type=jnp.float32)                      # (TB, 128)

    # (2) Input projection for BOTH LSTMs and ALL timesteps in one MXU matmul,
    #     bias folded in — hoisted off the serial recurrence critical path.
    xw = jnp.dot(e.astype(jnp.bfloat16), wih_ref[...],
                 preferred_element_type=jnp.float32) + b_ref[...]        # (TB, 512)
    xw_ref[...] = xw.reshape(xw_ref.shape)                               # (T, Bp, 512)

    # (3) Per-lane timestep map, built ONCE (hoisted out of the unrolled loop):
    #     first 64 lanes keyed by s1_len, last 64 lanes by s2_len.
    lane = lax.broadcasted_iota(jnp.int32, (Bp, _HH), 1)
    s_map = jnp.where(lane < HIDDEN,
                      jnp.broadcast_to(slen_ref[:, 0:1], (Bp, _HH)),
                      jnp.broadcast_to(slen_ref[:, 1:2], (Bp, _HH)))

    def sig(x):
        # sigmoid(x) == 0.5*(1 + tanh(x/2)): one EUP op per gate on the serial chain.
        return 0.5 * jnp.tanh(0.5 * x) + 0.5

    def step(t, carry):
        h, c, sel = carry                                    # (Bp,128) = [lstm1|lstm2]
        # (4) One fused recurrent matmul drives both LSTMs per step
        #     (bf16 operands, f32 accumulation, f32 gate math).
        gates = xw_ref[t] + jnp.dot(h.astype(jnp.bfloat16), whh_ref[...],
                                    preferred_element_type=jnp.float32)  # (Bp, 512)
        # 128-lane (vreg-aligned) gate slices; PyTorch gate order i, f, g, o.
        i = sig(gates[:, 0 * _HH:1 * _HH])
        f = sig(gates[:, 1 * _HH:2 * _HH])
        g = jnp.tanh(gates[:, 2 * _HH:3 * _HH])
        o = sig(gates[:, 3 * _HH:4 * _HH])
        c = f * c + i * g
        h = o * jnp.tanh(c)
        # emulate out.gather(1, s_len).squeeze(1): keep h at the requested timestep.
        sel = jnp.where(s_map == t, h, sel)
        return h, c, sel

    z = jnp.zeros((Bp, _HH), jnp.float32)
    # T is static and small -> fully unroll so MXU/EUP/VPU work co-issues across steps.
    _, _, feat = lax.fori_loop(0, T, step, (z, z, z), unroll=True)

    # (5) MLP head (dropout = identity at inference); output kept 128-lane dense.
    hid = jnp.tanh(jnp.dot(feat.astype(jnp.bfloat16), wl1_ref[...],
                           preferred_element_type=jnp.float32) + bl1_ref[...])
    out_ref[...] = (jnp.dot(hid.astype(jnp.bfloat16), wl_ref[...],
                            preferred_element_type=jnp.float32) + bl_ref[...])


# ------------------------------------------------------------------- weight repacking
def _pack_blockdiag(w1, w2, rows):
    """Two (d, 4H) LSTM weights -> (rows, 512) block matrix in bf16: gate-k columns
    are [gate_k(lstm1) | gate_k(lstm2)], rows split [input1 | input2 | zero pad]."""
    d1, d2, H = w1.shape[0], w2.shape[0], HIDDEN
    out = jnp.zeros((rows, _G), jnp.float32)
    for k in range(4):
        out = out.at[:d1, k * _HH:k * _HH + H].set(w1[:, k * H:(k + 1) * H])
        out = out.at[d1:d1 + d2, k * _HH + H:(k + 1) * _HH].set(w2[:, k * H:(k + 1) * H])
    return out.astype(jnp.bfloat16)


def _pack_bias(b1, b2):
    H = HIDDEN
    out = jnp.zeros((1, _G), jnp.float32)
    for k in range(4):
        out = out.at[:, k * _HH:k * _HH + H].set(b1[:, k * H:(k + 1) * H])
        out = out.at[:, k * _HH + H:(k + 1) * _HH].set(b2[:, k * H:(k + 1) * H])
    return out


def _pack_gather_table(emb, vpad):
    """Embedding rows laid out so a two-hot [id1, vpad+id2] row-select yields the
    lane-padded concat [embed1(50) | embed2(50) | 0...] in 128 lanes."""
    vocab, E = emb.shape
    g = jnp.zeros((2 * vpad, _KIN), jnp.float32)
    g = g.at[:vocab, :E].set(emb)
    g = g.at[vpad:vpad + vocab, E:2 * E].set(emb)
    return g.astype(jnp.bfloat16)


# ------------------------------------------------------------------------ host wrapper
def out2_cat_encoding(sentence1, sentence2, s1_len, s2_len, params):
    """Only tiny int32 glue stays in XLA; embedding gather + both LSTMs + MLP head all
    run inside one Pallas kernel. Weight repacking is one-time (cached in production)."""
    emb = params["embedding"].astype(jnp.float32)
    vocab = emb.shape[0]
    B, T = sentence1.shape
    Bp = max(8, ((B + 7) // 8) * 8)            # pad batch to a full sublane group
    vpad = ((vocab + 127) // 128) * 128        # vocab rows per sentence block

    # One-time weight repacking into fused bf16 layouts.
    gtab = _pack_gather_table(emb, vpad)                               # (2*vpad, 128)
    wih = _pack_blockdiag(params["w_ih1"], params["w_ih2"], _KIN)      # (128, 512)
    whh = _pack_blockdiag(params["w_hh1"], params["w_hh2"], _HH)       # (128, 512)
    bb = _pack_bias(params["b1"], params["b2"])                        # (1, 512) f32
    wl1 = params["w_l1"].astype(jnp.bfloat16)                          # (128, 128)
    bl1 = params["b_l1"].astype(jnp.float32)                           # (1, 128)
    wl = (jnp.zeros((_HH, _HH), jnp.float32)
          .at[:, :NUM_CLASSES].set(params["w_l"]).astype(jnp.bfloat16))  # lane-dense out
    bl = jnp.zeros((1, _HH), jnp.float32).at[:, :NUM_CLASSES].set(params["b_l"])

    # Tiny int32 glue: time-major token ids (sentence2 offset by vpad) + lengths.
    ids1 = jnp.pad(sentence1.astype(jnp.int32), ((0, Bp - B), (0, 0)))
    ids2 = jnp.pad(sentence2.astype(jnp.int32), ((0, Bp - B), (0, 0))) + vpad
    ids = jnp.stack([ids1, ids2], axis=-1).transpose(1, 0, 2).reshape(T * Bp, 2)
    slen = jnp.stack([jnp.pad(s1_len.astype(jnp.int32), (0, Bp - B)),
                      jnp.pad(s2_len.astype(jnp.int32), (0, Bp - B))], axis=-1)

    args = (ids, slen, gtab, wih, whh, bb, wl1, bl1, wl, bl)

    def full_spec(a):
        nd = a.ndim
        return pl.BlockSpec(a.shape, lambda i, nd=nd: (0,) * nd)

    out = pl.pallas_call(
        out2_kernel,
        out_shape=jax.ShapeDtypeStruct((Bp, _HH), jnp.float32),
        grid=(1,),
        in_specs=[full_spec(a) for a in args],
        out_specs=pl.BlockSpec((Bp, _HH), lambda i: (0, 0)),
        scratch_shapes=[pltpu.VMEM((T, Bp, _G), jnp.float32)],
        compiler_params=pltpu.CompilerParams(
            dimension_semantics=("arbitrary",)),
    )(*args)
    return out[:B, :NUM_CLASSES]


# -------------------------------------------------------------------- pure-JAX reference
def reference(sentence1, sentence2, s1_len, s2_len, params):
    """Pure-JAX f32 reference matching the PyTorch forward (eval mode)."""
    emb = params["embedding"]

    def lstm(e, w_ih, w_hh, b, slen):
        B, T, _ = e.shape
        H = HIDDEN
        h = jnp.zeros((B, H), jnp.float32)
        c = jnp.zeros((B, H), jnp.float32)
        outs = []
        for t in range(T):
            gates = e[:, t, :] @ w_ih + h @ w_hh + b
            i = jax.nn.sigmoid(gates[:, :H])
            f = jax.nn.sigmoid(gates[:, H:2 * H])
            g = jnp.tanh(gates[:, 2 * H:3 * H])
            o = jax.nn.sigmoid(gates[:, 3 * H:])
            c = f * c + i * g
            h = o * jnp.tanh(c)
            outs.append(h)
        seq = jnp.stack(outs, axis=1)                           # (B, T, H)
        return seq[jnp.arange(B), slen, :]

    e1 = emb[sentence1].astype(jnp.float32)
    e2 = emb[sentence2].astype(jnp.float32)
    h1 = lstm(e1, params["w_ih1"], params["w_hh1"], params["b1"], s1_len)
    h2 = lstm(e2, params["w_ih2"], params["w_hh2"], params["b2"], s2_len)
    feat = jnp.concatenate([h1, h2], axis=1)
    hid = jnp.tanh(feat @ params["w_l1"] + params["b_l1"])
    return hid @ params["w_l"] + params["b_l"]


def init_params(key, vect_len):
    vocab = vect_len + 4
    ks = jax.random.split(key, 11)

    def u(k, shape, scale):
        return jax.random.uniform(k, shape, jnp.float32, -scale, scale)

    k_lstm = 1.0 / math.sqrt(HIDDEN)
    k_l1 = 1.0 / math.sqrt(128)
    return {
        "embedding": u(ks[0], (vocab, EMBED), 0.5),
        # LSTM1 (PyTorch W_ih^T, W_hh^T, b_ih + b_hh fused), gate order [i, f, g, o]
        "w_ih1": u(ks[1], (EMBED, 4 * HIDDEN), k_lstm),
        "w_hh1": u(ks[2], (HIDDEN, 4 * HIDDEN), k_lstm),
        "b1": u(ks[3], (1, 4 * HIDDEN), k_lstm),
        # LSTM2
        "w_ih2": u(ks[4], (EMBED, 4 * HIDDEN), k_lstm),
        "w_hh2": u(ks[5], (HIDDEN, 4 * HIDDEN), k_lstm),
        "b2": u(ks[6], (1, 4 * HIDDEN), k_lstm),
        # l1: Linear(128, 128) (weights stored (in, out))
        "w_l1": u(ks[7], (128, 128), k_l1),
        "b_l1": u(ks[8], (1, 128), k_l1),
        # l: Linear(128, 4)
        "w_l": u(ks[9], (128, NUM_CLASSES), k_l1),
        "b_l": u(ks[10], (1, NUM_CLASSES), k_l1),
    }


if __name__ == "__main__":
    key = jax.random.PRNGKey(0)
    B, T, vect_len = 2, 8, 100
    vocab = vect_len + 4

    k_p, k_s1, k_s2 = jax.random.split(key, 3)
    params = init_params(k_p, vect_len)

    sentence1 = jax.random.randint(k_s1, (B, T), 0, vocab, dtype=jnp.int32)
    sentence2 = jax.random.randint(k_s2, (B, T), 0, vocab, dtype=jnp.int32)
    # per-example index of the last valid token (what s1_len/s2_len gather selects)
    s1_len = jnp.array([T - 1, 3], dtype=jnp.int32)
    s2_len = jnp.array([5, T - 1], dtype=jnp.int32)

    out = out2_cat_encoding(sentence1, sentence2, s1_len, s2_len, params)
    out = jax.block_until_ready(out)

    ref = reference(sentence1, sentence2, s1_len, s2_len, params)
    assert out.shape == (B, NUM_CLASSES)
    # Tolerance loosened vs the pure-f32 reference because MXU operands are bf16
    # (accumulation and gate math remain f32).
    assert jnp.allclose(out, ref, atol=2e-2, rtol=2e-2), (out, ref)

    print("KERNEL_OK")
</pallas_src>

<mosaic_0001>
module attributes {stable_mosaic.version = 11 : i64} {
  func.func @out2_kernel(%arg0: i32, %arg1: memref<64x2xi32, #tpu.memory_space<vmem>>, %arg2: memref<8x2xi32, #tpu.memory_space<vmem>>, %arg3: memref<256x128xbf16, #tpu.memory_space<vmem>>, %arg4: memref<128x512xbf16, #tpu.memory_space<vmem>>, %arg5: memref<128x512xbf16, #tpu.memory_space<vmem>>, %arg6: memref<1x512xf32, #tpu.memory_space<vmem>>, %arg7: memref<128x128xbf16, #tpu.memory_space<vmem>>, %arg8: memref<1x128xf32, #tpu.memory_space<vmem>>, %arg9: memref<128x128xbf16, #tpu.memory_space<vmem>>, %arg10: memref<1x128xf32, #tpu.memory_space<vmem>>, %arg11: memref<8x128xf32, #tpu.memory_space<vmem>>, %arg12: memref<8x8x512xf32, #tpu.memory_space<vmem>>) attributes {dimension_semantics = [#tpu.dimension_semantics<arbitrary>], iteration_bounds = array<i64: 1>, scalar_prefetch = 0 : i64, scratch_operands = 1 : i64, tpu.core_type = #tpu.core_type<tc>, window_params = [{pipeline_mode = #tpu.pipeline_mode<synchronous>, transform_indices = @transform_0, window_bounds = array<i64: 64, 2>}, {pipeline_mode = #tpu.pipeline_mode<synchronous>, transform_indices = @transform_1, window_bounds = array<i64: 8, 2>}, {pipeline_mode = #tpu.pipeline_mode<synchronous>, transform_indices = @transform_2, window_bounds = array<i64: 256, 128>}, {pipeline_mode = #tpu.pipeline_mode<synchronous>, transform_indices = @transform_3, window_bounds = array<i64: 128, 512>}, {pipeline_mode = #tpu.pipeline_mode<synchronous>, transform_indices = @transform_4, window_bounds = array<i64: 128, 512>}, {pipeline_mode = #tpu.pipeline_mode<synchronous>, transform_indices = @transform_5, window_bounds = array<i64: 1, 512>}, {pipeline_mode = #tpu.pipeline_mode<synchronous>, transform_indices = @transform_6, window_bounds = array<i64: 128, 128>}, {pipeline_mode = #tpu.pipeline_mode<synchronous>, transform_indices = @transform_7, window_bounds = array<i64: 1, 128>}, {pipeline_mode = #tpu.pipeline_mode<synchronous>, transform_indices = @transform_8, window_bounds = array<i64: 128, 128>}, {pipeline_mode = #tpu.pipeline_mode<synchronous>, transform_indices = @transform_9, window_bounds = array<i64: 1, 128>}, {pipeline_mode = #tpu.pipeline_mode<synchronous>, transform_indices = @transform_10, window_bounds = array<i64: 8, 128>}]} {
    %0 = tpu.iota {dimensions = array<i32: 1>} : vector<64x256xi32>
    %c0 = arith.constant 0 : index
    %c0_0 = arith.constant 0 : index
    %1 = vector.load %arg1[%c0, %c0_0] : memref<64x2xi32, #tpu.memory_space<vmem>>, vector<64x1xi32>
    %2 = vector.broadcast %1 : vector<64x1xi32> to vector<64x256xi32>
    %3 = arith.cmpi eq, %0, %2 : vector<64x256xi32>
    %c0_1 = arith.constant 0 : index
    %c1 = arith.constant 1 : index
    %4 = vector.load %arg1[%c0_1, %c1] : memref<64x2xi32, #tpu.memory_space<vmem>>, vector<64x1xi32>
    %5 = vector.broadcast %4 : vector<64x1xi32> to vector<64x256xi32>
    %6 = arith.cmpi eq, %0, %5 : vector<64x256xi32>
    %7 = arith.ori %3, %6 : vector<64x256xi1>
    %cst = arith.constant 1.000000e+00 : f32
    %cst_2 = arith.constant 0.000000e+00 : f32
    %8 = vector.broadcast %cst : f32 to vector<64x256xf32>
    %9 = vector.broadcast %cst_2 : f32 to vector<64x256xf32>
    %10 = arith.select %7, %8, %9 : vector<64x256xi1>, vector<64x256xf32>
    %11 = arith.truncf %10 : vector<64x256xf32> to vector<64x256xbf16>
    %c0_3 = arith.constant 0 : index
    %c0_4 = arith.constant 0 : index
    %12 = vector.load %arg3[%c0_3, %c0_4] : memref<256x128xbf16, #tpu.memory_space<vmem>>, vector<256x128xbf16>
    %cst_5 = arith.constant dense<0.000000e+00> : vector<64x128xf32>
    %13 = tpu.matmul %11, %12, %cst_5 {dimension_numbers = #tpu.dot_dimension_numbers<[1], [0], [0], [1], [0, 0, 1, 1], [], []>} : vector<64x256xbf16>, vector<256x128xbf16>, vector<64x128xf32> -> vector<64x128xf32>
    %14 = arith.truncf %13 : vector<64x128xf32> to vector<64x128xbf16>
    %c0_6 = arith.constant 0 : index
    %c0_7 = arith.constant 0 : index
    %15 = vector.load %arg4[%c0_6, %c0_7] : memref<128x512xbf16, #tpu.memory_space<vmem>>, vector<128x512xbf16>
    %cst_8 = arith.constant dense<0.000000e+00> : vector<64x512xf32>
    %16 = tpu.matmul %14, %15, %cst_8 {dimension_numbers = #tpu.dot_dimension_numbers<[1], [0], [0], [1], [0, 0, 1, 1], [], []>} : vector<64x128xbf16>, vector<128x512xbf16>, vector<64x512xf32> -> vector<64x512xf32>
    %c0_9 = arith.constant 0 : index
    %c0_10 = arith.constant 0 : index
    %17 = vector.load %arg6[%c0_9, %c0_10] : memref<1x512xf32, #tpu.memory_space<vmem>>, vector<1x512xf32>
    %18 = vector.broadcast %17 : vector<1x512xf32> to vector<64x512xf32>
    %19 = arith.addf %16, %18 : vector<64x512xf32>
    %20 = vector.shape_cast %19 : vector<64x512xf32> to vector<8x8x512xf32>
    %c0_11 = arith.constant 0 : index
    %c0_12 = arith.constant 0 : index
    %c0_13 = arith.constant 0 : index
    %21 = vector.load %arg12[%c0_11, %c0_12, %c0_13] : memref<8x8x512xf32, #tpu.memory_space<vmem>>, vector<8x8x512xf32>
    tpu.vector_store %arg12[%c0_11, %c0_12, %c0_13], %20 {strides = array<i32>} : memref<8x8x512xf32, #tpu.memory_space<vmem>>, vector<8x8x512xf32>,
    %22 = tpu.iota {dimensions = array<i32: 1>} : vector<8x128xi32>
    %c64_i32 = arith.constant 64 : i32
    %23 = vector.broadcast %c64_i32 : i32 to vector<8x128xi32>
    %24 = arith.cmpi slt, %22, %23 : vector<8x128xi32>
    %c0_14 = arith.constant 0 : index
    %c0_15 = arith.constant 0 : index
    %25 = vector.load %arg2[%c0_14, %c0_15] : memref<8x2xi32, #tpu.memory_space<vmem>>, vector<8x1xi32>
    %26 = vector.shape_cast %25 : vector<8x1xi32> to vector<8x1xi32>
    %27 = vector.broadcast %26 : vector<8x1xi32> to vector<8x128xi32>
    %c0_16 = arith.constant 0 : index
    %c1_17 = arith.constant 1 : index
    %28 = vector.load %arg2[%c0_16, %c1_17] : memref<8x2xi32, #tpu.memory_space<vmem>>, vector<8x1xi32>
    %29 = vector.shape_cast %28 : vector<8x1xi32> to vector<8x1xi32>
    %30 = vector.broadcast %29 : vector<8x1xi32> to vector<8x128xi32>
    %31 = arith.select %24, %27, %30 : vector<8x128xi1>, vector<8x128xi32>
    %cst_18 = arith.constant 0.000000e+00 : f32
    %32 = vector.broadcast %cst_18 : f32 to vector<8x128xf32>
    %c0_i32 = arith.constant 0 : i32
    %33 = arith.index_cast %c0_i32 : i32 to index
    %c0_19 = arith.constant 0 : index
    %c0_20 = arith.constant 0 : index
    %34 = vector.load %arg12[%33, %c0_19, %c0_20] : memref<8x8x512xf32, #tpu.memory_space<vmem>>, vector<1x8x512xf32>
    %35 = vector.shape_cast %34 : vector<1x8x512xf32> to vector<8x512xf32>
    %36 = arith.truncf %32 : vector<8x128xf32> to vector<8x128xbf16>
    %c0_21 = arith.constant 0 : index
    %c0_22 = arith.constant 0 : index
    %37 = vector.load %arg5[%c0_21, %c0_22] : memref<128x512xbf16, #tpu.memory_space<vmem>>, vector<128x512xbf16>
    %cst_23 = arith.constant dense<0.000000e+00> : vector<8x512xf32>
    %38 = tpu.matmul %36, %37, %cst_23 {dimension_numbers = #tpu.dot_dimension_numbers<[1], [0], [0], [1], [0, 0, 1, 1], [], []>} : vector<8x128xbf16>, vector<128x512xbf16>, vector<8x512xf32> -> vector<8x512xf32>
    %39 = arith.addf %35, %38 : vector<8x512xf32>
    %40 = vector.extract_strided_slice %39 {offsets = [0, 0], sizes = [8, 128], strides = [1, 1]} : vector<8x512xf32> to vector<8x128xf32>
    %cst_24 = arith.constant 5.000000e-01 : f32
    %41 = vector.broadcast %cst_24 : f32 to vector<8x128xf32>
    %42 = arith.mulf %41, %40 : vector<8x128xf32>
    %43 = math.tanh %42 : vector<8x128xf32>
    %cst_25 = arith.constant 5.000000e-01 : f32
    %44 = vector.broadcast %cst_25 : f32 to vector<8x128xf32>
    %45 = arith.mulf %44, %43 : vector<8x128xf32>
    %cst_26 = arith.constant 5.000000e-01 : f32
    %46 = vector.broadcast %cst_26 : f32 to vector<8x128xf32>
    %47 = arith.addf %45, %46 : vector<8x128xf32>
    %48 = vector.extract_strided_slice %39 {offsets = [0, 128], sizes = [8, 128], strides = [1, 1]} : vector<8x512xf32> to vector<8x128xf32>
    %cst_27 = arith.constant 5.000000e-01 : f32
    %49 = vector.broadcast %cst_27 : f32 to vector<8x128xf32>
    %50 = arith.mulf %49, %48 : vector<8x128xf32>
    %51 = math.tanh %50 : vector<8x128xf32>
    %cst_28 = arith.constant 5.000000e-01 : f32
    %52 = vector.broadcast %cst_28 : f32 to vector<8x128xf32>
    %53 = arith.mulf %52, %51 : vector<8x128xf32>
    %cst_29 = arith.constant 5.000000e-01 : f32
    %54 = vector.broadcast %cst_29 : f32 to vector<8x128xf32>
    %55 = arith.addf %53, %54 : vector<8x128xf32>
    %56 = vector.extract_strided_slice %39 {offsets = [0, 256], sizes = [8, 128], strides = [1, 1]} : vector<8x512xf32> to vector<8x128xf32>
    %57 = math.tanh %56 : vector<8x128xf32>
    %58 = vector.extract_strided_slice %39 {offsets = [0, 384], sizes = [8, 128], strides = [1, 1]} : vector<8x512xf32> to vector<8x128xf32>
    %cst_30 = arith.constant 5.000000e-01 : f32
    %59 = vector.broadcast %cst_30 : f32 to vector<8x128xf32>
    %60 = arith.mulf %59, %58 : vector<8x128xf32>
    %61 = math.tanh %60 : vector<8x128xf32>
    %cst_31 = arith.constant 5.000000e-01 : f32
    %62 = vector.broadcast %cst_31 : f32 to vector<8x128xf32>
    %63 = arith.mulf %62, %61 : vector<8x128xf32>
    %cst_32 = arith.constant 5.000000e-01 : f32
    %64 = vector.broadcast %cst_32 : f32 to vector<8x128xf32>
    %65 = arith.addf %63, %64 : vector<8x128xf32>
    %66 = arith.mulf %55, %32 : vector<8x128xf32>
    %67 = arith.mulf %47, %57 : vector<8x128xf32>
    %68 = arith.addf %66, %67 : vector<8x128xf32>
    %69 = math.tanh %68 : vector<8x128xf32>
    %70 = arith.mulf %65, %69 : vector<8x128xf32>
    %71 = vector.broadcast %c0_i32 : i32 to vector<8x128xi32>
    %72 = arith.cmpi eq, %31, %71 : vector<8x128xi32>
    %73 = arith.select %72, %70, %32 : vector<8x128xi1>, vector<8x128xf32>
    %c1_i32 = arith.constant 1 : i32
    %74 = arith.index_cast %c1_i32 : i32 to index
    %c0_33 = arith.constant 0 : index
    %c0_34 = arith.constant 0 : index
    %75 = vector.load %arg12[%74, %c0_33, %c0_34] : memref<8x8x512xf32, #tpu.memory_space<vmem>>, vector<1x8x512xf32>
    %76 = vector.shape_cast %75 : vector<1x8x512xf32> to vector<8x512xf32>
    %77 = arith.truncf %70 : vector<8x128xf32> to vector<8x128xbf16>
    %c0_35 = arith.constant 0 : index
    %c0_36 = arith.constant 0 : index
    %78 = vector.load %arg5[%c0_35, %c0_36] : memref<128x512xbf16, #tpu.memory_space<vmem>>, vector<128x512xbf16>
    %cst_37 = arith.constant dense<0.000000e+00> : vector<8x512xf32>
    %79 = tpu.matmul %77, %78, %cst_37 {dimension_numbers = #tpu.dot_dimension_numbers<[1], [0], [0], [1], [0, 0, 1, 1], [], []>} : vector<8x128xbf16>, vector<128x512xbf16>, vector<8x512xf32> -> vector<8x512xf32>
    %80 = arith.addf %76, %79 : vector<8x512xf32>
    %81 = vector.extract_strided_slice %80 {offsets = [0, 0], sizes = [8, 128], strides = [1, 1]} : vector<8x512xf32> to vector<8x128xf32>
    %cst_38 = arith.constant 5.000000e-01 : f32
    %82 = vector.broadcast %cst_38 : f32 to vector<8x128xf32>
    %83 = arith.mulf %82, %81 : vector<8x128xf32>
    %84 = math.tanh %83 : vector<8x128xf32>
    %cst_39 = arith.constant 5.000000e-01 : f32
    %85 = vector.broadcast %cst_39 : f32 to vector<8x128xf32>
    %86 = arith.mulf %85, %84 : vector<8x128xf32>
    %cst_40 = arith.constant 5.000000e-01 : f32
    %87 = vector.broadcast %cst_40 : f32 to vector<8x128xf32>
    %88 = arith.addf %86, %87 : vector<8x128xf32>
    %89 = vector.extract_strided_slice %80 {offsets = [0, 128], sizes = [8, 128], strides = [1, 1]} : vector<8x512xf32> to vector<8x128xf32>
    %cst_41 = arith.constant 5.000000e-01 : f32
    %90 = vector.broadcast %cst_41 : f32 to vector<8x128xf32>
    %91 = arith.mulf %90, %89 : vector<8x128xf32>
    %92 = math.tanh %91 : vector<8x128xf32>
    %cst_42 = arith.constant 5.000000e-01 : f32
    %93 = vector.broadcast %cst_42 : f32 to vector<8x128xf32>
    %94 = arith.mulf %93, %92 : vector<8x128xf32>
    %cst_43 = arith.constant 5.000000e-01 : f32
    %95 = vector.broadcast %cst_43 : f32 to vector<8x128xf32>
    %96 = arith.addf %94, %95 : vector<8x128xf32>
    %97 = vector.extract_strided_slice %80 {offsets = [0, 256], sizes = [8, 128], strides = [1, 1]} : vector<8x512xf32> to vector<8x128xf32>
    %98 = math.tanh %97 : vector<8x128xf32>
    %99 = vector.extract_strided_slice %80 {offsets = [0, 384], sizes = [8, 128], strides = [1, 1]} : vector<8x512xf32> to vector<8x128xf32>
    %cst_44 = arith.constant 5.000000e-01 : f32
    %100 = vector.broadcast %cst_44 : f32 to vector<8x128xf32>
    %101 = arith.mulf %100, %99 : vector<8x128xf32>
    %102 = math.tanh %101 : vector<8x128xf32>
    %cst_45 = arith.constant 5.000000e-01 : f32
    %103 = vector.broadcast %cst_45 : f32 to vector<8x128xf32>
    %104 = arith.mulf %103, %102 : vector<8x128xf32>
    %cst_46 = arith.constant 5.000000e-01 : f32
    %105 = vector.broadcast %cst_46 : f32 to vector<8x128xf32>
    %106 = arith.addf %104, %105 : vector<8x128xf32>
    %107 = arith.mulf %96, %68 : vector<8x128xf32>
    %108 = arith.mulf %88, %98 : vector<8x128xf32>
    %109 = arith.addf %107, %108 : vector<8x128xf32>
    %110 = math.tanh %109 : vector<8x128xf32>
    %111 = arith.mulf %106, %110 : vector<8x128xf32>
    %112 = vector.broadcast %c1_i32 : i32 to vector<8x128xi32>
    %113 = arith.cmpi eq, %31, %112 : vector<8x128xi32>
    %114 = arith.select %113, %111, %73 : vector<8x128xi1>, vector<8x128xf32>
    %c2_i32 = arith.constant 2 : i32
    %115 = arith.index_cast %c2_i32 : i32 to index
    %c0_47 = arith.constant 0 : index
    %c0_48 = arith.constant 0 : index
    %116 = vector.load %arg12[%115, %c0_47, %c0_48] : memref<8x8x512xf32, #tpu.memory_space<vmem>>, vector<1x8x512xf32>
    %117 = vector.shape_cast %116 : vector<1x8x512xf32> to vector<8x512xf32>
    %118 = arith.truncf %111 : vector<8x128xf32> to vector<8x128xbf16>
    %c0_49 = arith.constant 0 : index
    %c0_50 = arith.constant 0 : index
    %119 = vector.load %arg5[%c0_49, %c0_50] : memref<128x512xbf16, #tpu.memory_space<vmem>>, vector<128x512xbf16>
    %cst_51 = arith.constant dense<0.000000e+00> : vector<8x512xf32>
    %120 = tpu.matmul %118, %119, %cst_51 {dimension_numbers = #tpu.dot_dimension_numbers<[1], [0], [0], [1], [0, 0, 1, 1], [], []>} : vector<8x128xbf16>, vector<128x512xbf16>, vector<8x512xf32> -> vector<8x512xf32>
    %121 = arith.addf %117, %120 : vector<8x512xf32>
    %122 = vector.extract_strided_slice %121 {offsets = [0, 0], sizes = [8, 128], strides = [1, 1]} : vector<8x512xf32> to vector<8x128xf32>
    %cst_52 = arith.constant 5.000000e-01 : f32
    %123 = vector.broadcast %cst_52 : f32 to vector<8x128xf32>
    %124 = arith.mulf %123, %122 : vector<8x128xf32>
    %125 = math.tanh %124 : vector<8x128xf32>
    %cst_53 = arith.constant 5.000000e-01 : f32
    %126 = vector.broadcast %cst_53 : f32 to vector<8x128xf32>
    %127 = arith.mulf %126, %125 : vector<8x128xf32>
    %cst_54 = arith.constant 5.000000e-01 : f32
    %128 = vector.broadcast %cst_54 : f32 to vector<8x128xf32>
    %129 = arith.addf %127, %128 : vector<8x128xf32>
    %130 = vector.extract_strided_slice %121 {offsets = [0, 128], sizes = [8, 128], strides = [1, 1]} : vector<8x512xf32> to vector<8x128xf32>
    %cst_55 = arith.constant 5.000000e-01 : f32
    %131 = vector.broadcast %cst_55 : f32 to vector<8x128xf32>
    %132 = arith.mulf %131, %130 : vector<8x128xf32>
    %133 = math.tanh %132 : vector<8x128xf32>
    %cst_56 = arith.constant 5.000000e-01 : f32
    %134 = vector.broadcast %cst_56 : f32 to vector<8x128xf32>
    %135 = arith.mulf %134, %133 : vector<8x128xf32>
    %cst_57 = arith.constant 5.000000e-01 : f32
    %136 = vector.broadcast %cst_57 : f32 to vector<8x128xf32>
    %137 = arith.addf %135, %136 : vector<8x128xf32>
    %138 = vector.extract_strided_slice %121 {offsets = [0, 256], sizes = [8, 128], strides = [1, 1]} : vector<8x512xf32> to vector<8x128xf32>
    %139 = math.tanh %138 : vector<8x128xf32>
    %140 = vector.extract_strided_slice %121 {offsets = [0, 384], sizes = [8, 128], strides = [1, 1]} : vector<8x512xf32> to vector<8x128xf32>
    %cst_58 = arith.constant 5.000000e-01 : f32
    %141 = vector.broadcast %cst_58 : f32 to vector<8x128xf32>
    %142 = arith.mulf %141, %140 : vector<8x128xf32>
    %143 = math.tanh %142 : vector<8x128xf32>
    %cst_59 = arith.constant 5.000000e-01 : f32
    %144 = vector.broadcast %cst_59 : f32 to vector<8x128xf32>
    %145 = arith.mulf %144, %143 : vector<8x128xf32>
    %cst_60 = arith.constant 5.000000e-01 : f32
    %146 = vector.broadcast %cst_60 : f32 to vector<8x128xf32>
    %147 = arith.addf %145, %146 : vector<8x128xf32>
    %148 = arith.mulf %137, %109 : vector<8x128xf32>
    %149 = arith.mulf %129, %139 : vector<8x128xf32>
    %150 = arith.addf %148, %149 : vector<8x128xf32>
    %151 = math.tanh %150 : vector<8x128xf32>
    %152 = arith.mulf %147, %151 : vector<8x128xf32>
    %153 = vector.broadcast %c2_i32 : i32 to vector<8x128xi32>
    %154 = arith.cmpi eq, %31, %153 : vector<8x128xi32>
    %155 = arith.select %154, %152, %114 : vector<8x128xi1>, vector<8x128xf32>
    %c3_i32 = arith.constant 3 : i32
    %156 = arith.index_cast %c3_i32 : i32 to index
    %c0_61 = arith.constant 0 : index
    %c0_62 = arith.constant 0 : index
    %157 = vector.load %arg12[%156, %c0_61, %c0_62] : memref<8x8x512xf32, #tpu.memory_space<vmem>>, vector<1x8x512xf32>
    %158 = vector.shape_cast %157 : vector<1x8x512xf32> to vector<8x512xf32>
    %159 = arith.truncf %152 : vector<8x128xf32> to vector<8x128xbf16>
    %c0_63 = arith.constant 0 : index
    %c0_64 = arith.constant 0 : index
    %160 = vector.load %arg5[%c0_63, %c0_64] : memref<128x512xbf16, #tpu.memory_space<vmem>>, vector<128x512xbf16>
    %cst_65 = arith.constant dense<0.000000e+00> : vector<8x512xf32>
    %161 = tpu.matmul %159, %160, %cst_65 {dimension_numbers = #tpu.dot_dimension_numbers<[1], [0], [0], [1], [0, 0, 1, 1], [], []>} : vector<8x128xbf16>, vector<128x512xbf16>, vector<8x512xf32> -> vector<8x512xf32>
    %162 = arith.addf %158, %161 : vector<8x512xf32>
    %163 = vector.extract_strided_slice %162 {offsets = [0, 0], sizes = [8, 128], strides = [1, 1]} : vector<8x512xf32> to vector<8x128xf32>
    %cst_66 = arith.constant 5.000000e-01 : f32
    %164 = vector.broadcast %cst_66 : f32 to vector<8x128xf32>
    %165 = arith.mulf %164, %163 : vector<8x128xf32>
    %166 = math.tanh %165 : vector<8x128xf32>
    %cst_67 = arith.constant 5.000000e-01 : f32
    %167 = vector.broadcast %cst_67 : f32 to vector<8x128xf32>
    %168 = arith.mulf %167, %166 : vector<8x128xf32>
    %cst_68 = arith.constant 5.000000e-01 : f32
    %169 = vector.broadcast %cst_68 : f32 to vector<8x128xf32>
    %170 = arith.addf %168, %169 : vector<8x128xf32>
    %171 = vector.extract_strided_slice %162 {offsets = [0, 128], sizes = [8, 128], strides = [1, 1]} : vector<8x512xf32> to vector<8x128xf32>
    %cst_69 = arith.constant 5.000000e-01 : f32
    %172 = vector.broadcast %cst_69 : f32 to vector<8x128xf32>
    %173 = arith.mulf %172, %171 : vector<8x128xf32>
    %174 = math.tanh %173 : vector<8x128xf32>
    %cst_70 = arith.constant 5.000000e-01 : f32
    %175 = vector.broadcast %cst_70 : f32 to vector<8x128xf32>
    %176 = arith.mulf %175, %174 : vector<8x128xf32>
    %cst_71 = arith.constant 5.000000e-01 : f32
    %177 = vector.broadcast %cst_71 : f32 to vector<8x128xf32>
    %178 = arith.addf %176, %177 : vector<8x128xf32>
    %179 = vector.extract_strided_slice %162 {offsets = [0, 256], sizes = [8, 128], strides = [1, 1]} : vector<8x512xf32> to vector<8x128xf32>
    %180 = math.tanh %179 : vector<8x128xf32>
    %181 = vector.extract_strided_slice %162 {offsets = [0, 384], sizes = [8, 128], strides = [1, 1]} : vector<8x512xf32> to vector<8x128xf32>
    %cst_72 = arith.constant 5.000000e-01 : f32
    %182 = vector.broadcast %cst_72 : f32 to vector<8x128xf32>
    %183 = arith.mulf %182, %181 : vector<8x128xf32>
    %184 = math.tanh %183 : vector<8x128xf32>
    %cst_73 = arith.constant 5.000000e-01 : f32
    %185 = vector.broadcast %cst_73 : f32 to vector<8x128xf32>
    %186 = arith.mulf %185, %184 : vector<8x128xf32>
    %cst_74 = arith.constant 5.000000e-01 : f32
    %187 = vector.broadcast %cst_74 : f32 to vector<8x128xf32>
    %188 = arith.addf %186, %187 : vector<8x128xf32>
    %189 = arith.mulf %178, %150 : vector<8x128xf32>
    %190 = arith.mulf %170, %180 : vector<8x128xf32>
    %191 = arith.addf %189, %190 : vector<8x128xf32>
    %192 = math.tanh %191 : vector<8x128xf32>
    %193 = arith.mulf %188, %192 : vector<8x128xf32>
    %194 = vector.broadcast %c3_i32 : i32 to vector<8x128xi32>
    %195 = arith.cmpi eq, %31, %194 : vector<8x128xi32>
    %196 = arith.select %195, %193, %155 : vector<8x128xi1>, vector<8x128xf32>
    %c4_i32 = arith.constant 4 : i32
    %197 = arith.index_cast %c4_i32 : i32 to index
    %c0_75 = arith.constant 0 : index
    %c0_76 = arith.constant 0 : index
    %198 = vector.load %arg12[%197, %c0_75, %c0_76] : memref<8x8x512xf32, #tpu.memory_space<vmem>>, vector<1x8x512xf32>
    %199 = vector.shape_cast %198 : vector<1x8x512xf32> to vector<8x512xf32>
    %200 = arith.truncf %193 : vector<8x128xf32> to vector<8x128xbf16>
    %c0_77 = arith.constant 0 : index
    %c0_78 = arith.constant 0 : index
    %201 = vector.load %arg5[%c0_77, %c0_78] : memref<128x512xbf16, #tpu.memory_space<vmem>>, vector<128x512xbf16>
    %cst_79 = arith.constant dense<0.000000e+00> : vector<8x512xf32>
    %202 = tpu.matmul %200, %201, %cst_79 {dimension_numbers = #tpu.dot_dimension_numbers<[1], [0], [0], [1], [0, 0, 1, 1], [], []>} : vector<8x128xbf16>, vector<128x512xbf16>, vector<8x512xf32> -> vector<8x512xf32>
    %203 = arith.addf %199, %202 : vector<8x512xf32>
    %204 = vector.extract_strided_slice %203 {offsets = [0, 0], sizes = [8, 128], strides = [1, 1]} : vector<8x512xf32> to vector<8x128xf32>
    %cst_80 = arith.constant 5.000000e-01 : f32
    %205 = vector.broadcast %cst_80 : f32 to vector<8x128xf32>
    %206 = arith.mulf %205, %204 : vector<8x128xf32>
    %207 = math.tanh %206 : vector<8x128xf32>
    %cst_81 = arith.constant 5.000000e-01 : f32
    %208 = vector.broadcast %cst_81 : f32 to vector<8x128xf32>
    %209 = arith.mulf %208, %207 : vector<8x128xf32>
    %cst_82 = arith.constant 5.000000e-01 : f32
    %210 = vector.broadcast %cst_82 : f32 to vector<8x128xf32>
    %211 = arith.addf %209, %210 : vector<8x128xf32>
    %212 = vector.extract_strided_slice %203 {offsets = [0, 128], sizes = [8, 128], strides = [1, 1]} : vector<8x512xf32> to vector<8x128xf32>
    %cst_83 = arith.constant 5.000000e-01 : f32
    %213 = vector.broadcast %cst_83 : f32 to vector<8x128xf32>
    %214 = arith.mulf %213, %212 : vector<8x128xf32>
    %215 = math.tanh %214 : vector<8x128xf32>
    %cst_84 = arith.constant 5.000000e-01 : f32
    %216 = vector.broadcast %cst_84 : f32 to vector<8x128xf32>
    %217 = arith.mulf %216, %215 : vector<8x128xf32>
    %cst_85 = arith.constant 5.000000e-01 : f32
    %218 = vector.broadcast %cst_85 : f32 to vector<8x128xf32>
    %219 = arith.addf %217, %218 : vector<8x128xf32>
    %220 = vector.extract_strided_slice %203 {offsets = [0, 256], sizes = [8, 128], strides = [1, 1]} : vector<8x512xf32> to vector<8x128xf32>
    %221 = math.tanh %220 : vector<8x128xf32>
    %222 = vector.extract_strided_slice %203 {offsets = [0, 384], sizes = [8, 128], strides = [1, 1]} : vector<8x512xf32> to vector<8x128xf32>
    %cst_86 = arith.constant 5.000000e-01 : f32
    %223 = vector.broadcast %cst_86 : f32 to vector<8x128xf32>
    %224 = arith.mulf %223, %222 : vector<8x128xf32>
    %225 = math.tanh %224 : vector<8x128xf32>
    %cst_87 = arith.constant 5.000000e-01 : f32
    %226 = vector.broadcast %cst_87 : f32 to vector<8x128xf32>
    %227 = arith.mulf %226, %225 : vector<8x128xf32>
    %cst_88 = arith.constant 5.000000e-01 : f32
    %228 = vector.broadcast %cst_88 : f32 to vector<8x128xf32>
    %229 = arith.addf %227, %228 : vector<8x128xf32>
    %230 = arith.mulf %219, %191 : vector<8x128xf32>
    %231 = arith.mulf %211, %221 : vector<8x128xf32>
    %232 = arith.addf %230, %231 : vector<8x128xf32>
    %233 = math.tanh %232 : vector<8x128xf32>
    %234 = arith.mulf %229, %233 : vector<8x128xf32>
    %235 = vector.broadcast %c4_i32 : i32 to vector<8x128xi32>
    %236 = arith.cmpi eq, %31, %235 : vector<8x128xi32>
    %237 = arith.select %236, %234, %196 : vector<8x128xi1>, vector<8x128xf32>
    %c5_i32 = arith.constant 5 : i32
    %238 = arith.index_cast %c5_i32 : i32 to index
    %c0_89 = arith.constant 0 : index
    %c0_90 = arith.constant 0 : index
    %239 = vector.load %arg12[%238, %c0_89, %c0_90] : memref<8x8x512xf32, #tpu.memory_space<vmem>>, vector<1x8x512xf32>
    %240 = vector.shape_cast %239 : vector<1x8x512xf32> to vector<8x512xf32>
    %241 = arith.truncf %234 : vector<8x128xf32> to vector<8x128xbf16>
    %c0_91 = arith.constant 0 : index
    %c0_92 = arith.constant 0 : index
    %242 = vector.load %arg5[%c0_91, %c0_92] : memref<128x512xbf16, #tpu.memory_space<vmem>>, vector<128x512xbf16>
    %cst_93 = arith.constant dense<0.000000e+00> : vector<8x512xf32>
    %243 = tpu.matmul %241, %242, %cst_93 {dimension_numbers = #tpu.dot_dimension_numbers<[1], [0], [0], [1], [0, 0, 1, 1], [], []>} : vector<8x128xbf16>, vector<128x512xbf16>, vector<8x512xf32> -> vector<8x512xf32>
    %244 = arith.addf %240, %243 : vector<8x512xf32>
    %245 = vector.extract_strided_slice %244 {offsets = [0, 0], sizes = [8, 128], strides = [1, 1]} : vector<8x512xf32> to vector<8x128xf32>
    %cst_94 = arith.constant 5.000000e-01 : f32
    %246 = vector.broadcast %cst_94 : f32 to vector<8x128xf32>
    %247 = arith.mulf %246, %245 : vector<8x128xf32>
    %248 = math.tanh %247 : vector<8x128xf32>
    %cst_95 = arith.constant 5.000000e-01 : f32
    %249 = vector.broadcast %cst_95 : f32 to vector<8x128xf32>
    %250 = arith.mulf %249, %248 : vector<8x128xf32>
    %cst_96 = arith.constant 5.000000e-01 : f32
    %251 = vector.broadcast %cst_96 : f32 to vector<8x128xf32>
    %252 = arith.addf %250, %251 : vector<8x128xf32>
    %253 = vector.extract_strided_slice %244 {offsets = [0, 128], sizes = [8, 128], strides = [1, 1]} : vector<8x512xf32> to vector<8x128xf32>
    %cst_97 = arith.constant 5.000000e-01 : f32
    %254 = vector.broadcast %cst_97 : f32 to vector<8x128xf32>
    %255 = arith.mulf %254, %253 : vector<8x128xf32>
    %256 = math.tanh %255 : vector<8x128xf32>
    %cst_98 = arith.constant 5.000000e-01 : f32
    %257 = vector.broadcast %cst_98 : f32 to vector<8x128xf32>
    %258 = arith.mulf %257, %256 : vector<8x128xf32>
    %cst_99 = arith.constant 5.000000e-01 : f32
    %259 = vector.broadcast %cst_99 : f32 to vector<8x128xf32>
    %260 = arith.addf %258, %259 : vector<8x128xf32>
    %261 = vector.extract_strided_slice %244 {offsets = [0, 256], sizes = [8, 128], strides = [1, 1]} : vector<8x512xf32> to vector<8x128xf32>
    %262 = math.tanh %261 : vector<8x128xf32>
    %263 = vector.extract_strided_slice %244 {offsets = [0, 384], sizes = [8, 128], strides = [1, 1]} : vector<8x512xf32> to vector<8x128xf32>
    %cst_100 = arith.constant 5.000000e-01 : f32
    %264 = vector.broadcast %cst_100 : f32 to vector<8x128xf32>
    %265 = arith.mulf %264, %263 : vector<8x128xf32>
    %266 = math.tanh %265 : vector<8x128xf32>
    %cst_101 = arith.constant 5.000000e-01 : f32
    %267 = vector.broadcast %cst_101 : f32 to vector<8x128xf32>
    %268 = arith.mulf %267, %266 : vector<8x128xf32>
    %cst_102 = arith.constant 5.000000e-01 : f32
    %269 = vector.broadcast %cst_102 : f32 to vector<8x128xf32>
    %270 = arith.addf %268, %269 : vector<8x128xf32>
    %271 = arith.mulf %260, %232 : vector<8x128xf32>
    %272 = arith.mulf %252, %262 : vector<8x128xf32>
    %273 = arith.addf %271, %272 : vector<8x128xf32>
    %274 = math.tanh %273 : vector<8x128xf32>
    %275 = arith.mulf %270, %274 : vector<8x128xf32>
    %276 = vector.broadcast %c5_i32 : i32 to vector<8x128xi32>
    %277 = arith.cmpi eq, %31, %276 : vector<8x128xi32>
    %278 = arith.select %277, %275, %237 : vector<8x128xi1>, vector<8x128xf32>
    %c6_i32 = arith.constant 6 : i32
    %279 = arith.index_cast %c6_i32 : i32 to index
    %c0_103 = arith.constant 0 : index
    %c0_104 = arith.constant 0 : index
    %280 = vector.load %arg12[%279, %c0_103, %c0_104] : memref<8x8x512xf32, #tpu.memory_space<vmem>>, vector<1x8x512xf32>
    %281 = vector.shape_cast %280 : vector<1x8x512xf32> to vector<8x512xf32>
    %282 = arith.truncf %275 : vector<8x128xf32> to vector<8x128xbf16>
    %c0_105 = arith.constant 0 : index
    %c0_106 = arith.constant 0 : index
    %283 = vector.load %arg5[%c0_105, %c0_106] : memref<128x512xbf16, #tpu.memory_space<vmem>>, vector<128x512xbf16>
    %cst_107 = arith.constant dense<0.000000e+00> : vector<8x512xf32>
    %284 = tpu.matmul %282, %283, %cst_107 {dimension_numbers = #tpu.dot_dimension_numbers<[1], [0], [0], [1], [0, 0, 1, 1], [], []>} : vector<8x128xbf16>, vector<128x512xbf16>, vector<8x512xf32> -> vector<8x512xf32>
    %285 = arith.addf %281, %284 : vector<8x512xf32>
    %286 = vector.extract_strided_slice %285 {offsets = [0, 0], sizes = [8, 128], strides = [1, 1]} : vector<8x512xf32> to vector<8x128xf32>
    %cst_108 = arith.constant 5.000000e-01 : f32
    %287 = vector.broadcast %cst_108 : f32 to vector<8x128xf32>
    %288 = arith.mulf %287, %286 : vector<8x128xf32>
    %289 = math.tanh %288 : vector<8x128xf32>
    %cst_109 = arith.constant 5.000000e-01 : f32
    %290 = vector.broadcast %cst_109 : f32 to vector<8x128xf32>
    %291 = arith.mulf %290, %289 : vector<8x128xf32>
    %cst_110 = arith.constant 5.000000e-01 : f32
    %292 = vector.broadcast %cst_110 : f32 to vector<8x128xf32>
    %293 = arith.addf %291, %292 : vector<8x128xf32>
    %294 = vector.extract_strided_slice %285 {offsets = [0, 128], sizes = [8, 128], strides = [1, 1]} : vector<8x512xf32> to vector<8x128xf32>
    %cst_111 = arith.constant 5.000000e-01 : f32
    %295 = vector.broadcast %cst_111 : f32 to vector<8x128xf32>
    %296 = arith.mulf %295, %294 : vector<8x128xf32>
    %297 = math.tanh %296 : vector<8x128xf32>
    %cst_112 = arith.constant 5.000000e-01 : f32
    %298 = vector.broadcast %cst_112 : f32 to vector<8x128xf32>
    %299 = arith.mulf %298, %297 : vector<8x128xf32>
    %cst_113 = arith.constant 5.000000e-01 : f32
    %300 = vector.broadcast %cst_113 : f32 to vector<8x128xf32>
    %301 = arith.addf %299, %300 : vector<8x128xf32>
    %302 = vector.extract_strided_slice %285 {offsets = [0, 256], sizes = [8, 128], strides = [1, 1]} : vector<8x512xf32> to vector<8x128xf32>
    %303 = math.tanh %302 : vector<8x128xf32>
    %304 = vector.extract_strided_slice %285 {offsets = [0, 384], sizes = [8, 128], strides = [1, 1]} : vector<8x512xf32> to vector<8x128xf32>
    %cst_114 = arith.constant 5.000000e-01 : f32
    %305 = vector.broadcast %cst_114 : f32 to vector<8x128xf32>
    %306 = arith.mulf %305, %304 : vector<8x128xf32>
    %307 = math.tanh %306 : vector<8x128xf32>
    %cst_115 = arith.constant 5.000000e-01 : f32
    %308 = vector.broadcast %cst_115 : f32 to vector<8x128xf32>
    %309 = arith.mulf %308, %307 : vector<8x128xf32>
    %cst_116 = arith.constant 5.000000e-01 : f32
    %310 = vector.broadcast %cst_116 : f32 to vector<8x128xf32>
    %311 = arith.addf %309, %310 : vector<8x128xf32>
    %312 = arith.mulf %301, %273 : vector<8x128xf32>
    %313 = arith.mulf %293, %303 : vector<8x128xf32>
    %314 = arith.addf %312, %313 : vector<8x128xf32>
    %315 = math.tanh %314 : vector<8x128xf32>
    %316 = arith.mulf %311, %315 : vector<8x128xf32>
    %317 = vector.broadcast %c6_i32 : i32 to vector<8x128xi32>
    %318 = arith.cmpi eq, %31, %317 : vector<8x128xi32>
    %319 = arith.select %318, %316, %278 : vector<8x128xi1>, vector<8x128xf32>
    %c7_i32 = arith.constant 7 : i32
    %320 = arith.index_cast %c7_i32 : i32 to index
    %c0_117 = arith.constant 0 : index
    %c0_118 = arith.constant 0 : index
    %321 = vector.load %arg12[%320, %c0_117, %c0_118] : memref<8x8x512xf32, #tpu.memory_space<vmem>>, vector<1x8x512xf32>
    %322 = vector.shape_cast %321 : vector<1x8x512xf32> to vector<8x512xf32>
    %323 = arith.truncf %316 : vector<8x128xf32> to vector<8x128xbf16>
    %c0_119 = arith.constant 0 : index
    %c0_120 = arith.constant 0 : index
    %324 = vector.load %arg5[%c0_119, %c0_120] : memref<128x512xbf16, #tpu.memory_space<vmem>>, vector<128x512xbf16>
    %cst_121 = arith.constant dense<0.000000e+00> : vector<8x512xf32>
    %325 = tpu.matmul %323, %324, %cst_121 {dimension_numbers = #tpu.dot_dimension_numbers<[1], [0], [0], [1], [0, 0, 1, 1], [], []>} : vector<8x128xbf16>, vector<128x512xbf16>, vector<8x512xf32> -> vector<8x512xf32>
    %326 = arith.addf %322, %325 : vector<8x512xf32>
    %327 = vector.extract_strided_slice %326 {offsets = [0, 0], sizes = [8, 128], strides = [1, 1]} : vector<8x512xf32> to vector<8x128xf32>
    %cst_122 = arith.constant 5.000000e-01 : f32
    %328 = vector.broadcast %cst_122 : f32 to vector<8x128xf32>
    %329 = arith.mulf %328, %327 : vector<8x128xf32>
    %330 = math.tanh %329 : vector<8x128xf32>
    %cst_123 = arith.constant 5.000000e-01 : f32
    %331 = vector.broadcast %cst_123 : f32 to vector<8x128xf32>
    %332 = arith.mulf %331, %330 : vector<8x128xf32>
    %cst_124 = arith.constant 5.000000e-01 : f32
    %333 = vector.broadcast %cst_124 : f32 to vector<8x128xf32>
    %334 = arith.addf %332, %333 : vector<8x128xf32>
    %335 = vector.extract_strided_slice %326 {offsets = [0, 128], sizes = [8, 128], strides = [1, 1]} : vector<8x512xf32> to vector<8x128xf32>
    %cst_125 = arith.constant 5.000000e-01 : f32
    %336 = vector.broadcast %cst_125 : f32 to vector<8x128xf32>
    %337 = arith.mulf %336, %335 : vector<8x128xf32>
    %338 = math.tanh %337 : vector<8x128xf32>
    %cst_126 = arith.constant 5.000000e-01 : f32
    %339 = vector.broadcast %cst_126 : f32 to vector<8x128xf32>
    %340 = arith.mulf %339, %338 : vector<8x128xf32>
    %cst_127 = arith.constant 5.000000e-01 : f32
    %341 = vector.broadcast %cst_127 : f32 to vector<8x128xf32>
    %342 = arith.addf %340, %341 : vector<8x128xf32>
    %343 = vector.extract_strided_slice %326 {offsets = [0, 256], sizes = [8, 128], strides = [1, 1]} : vector<8x512xf32> to vector<8x128xf32>
    %344 = math.tanh %343 : vector<8x128xf32>
    %345 = vector.extract_strided_slice %326 {offsets = [0, 384], sizes = [8, 128], strides = [1, 1]} : vector<8x512xf32> to vector<8x128xf32>
    %cst_128 = arith.constant 5.000000e-01 : f32
    %346 = vector.broadcast %cst_128 : f32 to vector<8x128xf32>
    %347 = arith.mulf %346, %345 : vector<8x128xf32>
    %348 = math.tanh %347 : vector<8x128xf32>
    %cst_129 = arith.constant 5.000000e-01 : f32
    %349 = vector.broadcast %cst_129 : f32 to vector<8x128xf32>
    %350 = arith.mulf %349, %348 : vector<8x128xf32>
    %cst_130 = arith.constant 5.000000e-01 : f32
    %351 = vector.broadcast %cst_130 : f32 to vector<8x128xf32>
    %352 = arith.addf %350, %351 : vector<8x128xf32>
    %353 = arith.mulf %342, %314 : vector<8x128xf32>
    %354 = arith.mulf %334, %344 : vector<8x128xf32>
    %355 = arith.addf %353, %354 : vector<8x128xf32>
    %356 = math.tanh %355 : vector<8x128xf32>
    %357 = arith.mulf %352, %356 : vector<8x128xf32>
    %358 = vector.broadcast %c7_i32 : i32 to vector<8x128xi32>
    %359 = arith.cmpi eq, %31, %358 : vector<8x128xi32>
    %360 = arith.select %359, %357, %319 : vector<8x128xi1>, vector<8x128xf32>
    %c8_i32 = arith.constant 8 : i32
    %361 = arith.truncf %360 : vector<8x128xf32> to vector<8x128xbf16>
    %c0_131 = arith.constant 0 : index
    %c0_132 = arith.constant 0 : index
    %362 = vector.load %arg7[%c0_131, %c0_132] : memref<128x128xbf16, #tpu.memory_space<vmem>>, vector<128x128xbf16>
    %cst_133 = arith.constant dense<0.000000e+00> : vector<8x128xf32>
    %363 = tpu.matmul %361, %362, %cst_133 {dimension_numbers = #tpu.dot_dimension_numbers<[1], [0], [0], [1], [0, 0, 1, 1], [], []>} : vector<8x128xbf16>, vector<128x128xbf16>, vector<8x128xf32> -> vector<8x128xf32>
    %c0_134 = arith.constant 0 : index
    %c0_135 = arith.constant 0 : index
    %364 = vector.load %arg8[%c0_134, %c0_135] : memref<1x128xf32, #tpu.memory_space<vmem>>, vector<1x128xf32>
    %365 = vector.broadcast %364 : vector<1x128xf32> to vector<8x128xf32>
    %366 = arith.addf %363, %365 : vector<8x128xf32>
    %367 = math.tanh %366 : vector<8x128xf32>
    %368 = arith.truncf %367 : vector<8x128xf32> to vector<8x128xbf16>
    %c0_136 = arith.constant 0 : index
    %c0_137 = arith.constant 0 : index
    %369 = vector.load %arg9[%c0_136, %c0_137] : memref<128x128xbf16, #tpu.memory_space<vmem>>, vector<128x128xbf16>
    %cst_138 = arith.constant dense<0.000000e+00> : vector<8x128xf32>
    %370 = tpu.matmul %368, %369, %cst_138 {dimension_numbers = #tpu.dot_dimension_numbers<[1], [0], [0], [1], [0, 0, 1, 1], [], []>} : vector<8x128xbf16>, vector<128x128xbf16>, vector<8x128xf32> -> vector<8x128xf32>
    %c0_139 = arith.constant 0 : index
    %c0_140 = arith.constant 0 : index
    %371 = vector.load %arg10[%c0_139, %c0_140] : memref<1x128xf32, #tpu.memory_space<vmem>>, vector<1x128xf32>
    %372 = vector.broadcast %371 : vector<1x128xf32> to vector<8x128xf32>
    %373 = arith.addf %370, %372 : vector<8x128xf32>
    %c0_141 = arith.constant 0 : index
    %c0_142 = arith.constant 0 : index
    %374 = vector.load %arg11[%c0_141, %c0_142] : memref<8x128xf32, #tpu.memory_space<vmem>>, vector<8x128xf32>
    tpu.vector_store %arg11[%c0_141, %c0_142], %373 {strides = array<i32>} : memref<8x128xf32, #tpu.memory_space<vmem>>, vector<8x128xf32>,
    return
  }
  func.func @transform_0(%arg0: i32) -> (i32, i32) {
    %c0_i32 = arith.constant 0 : i32
    %c0_i32_0 = arith.constant 0 : i32
    %c0_i32_1 = arith.constant 0 : i32
    return %c0_i32, %c0_i32_0 : i32, i32
  }
  func.func @transform_1(%arg0: i32) -> (i32, i32) {
    %c0_i32 = arith.constant 0 : i32
    %c0_i32_0 = arith.constant 0 : i32
    %c0_i32_1 = arith.constant 0 : i32
    return %c0_i32, %c0_i32_0 : i32, i32
  }
  func.func @transform_2(%arg0: i32) -> (i32, i32) {
    %c0_i32 = arith.constant 0 : i32
    %c0_i32_0 = arith.constant 0 : i32
    %c0_i32_1 = arith.constant 0 : i32
    return %c0_i32, %c0_i32_0 : i32, i32
  }
  func.func @transform_3(%arg0: i32) -> (i32, i32) {
    %c0_i32 = arith.constant 0 : i32
    %c0_i32_0 = arith.constant 0 : i32
    %c0_i32_1 = arith.constant 0 : i32
    return %c0_i32, %c0_i32_0 : i32, i32
  }
  func.func @transform_4(%arg0: i32) -> (i32, i32) {
    %c0_i32 = arith.constant 0 : i32
    %c0_i32_0 = arith.constant 0 : i32
    %c0_i32_1 = arith.constant 0 : i32
    return %c0_i32, %c0_i32_0 : i32, i32
  }
  func.func @transform_5(%arg0: i32) -> (i32, i32) {
    %c0_i32 = arith.constant 0 : i32
    %c0_i32_0 = arith.constant 0 : i32
    %c0_i32_1 = arith.constant 0 : i32
    return %c0_i32, %c0_i32_0 : i32, i32
  }
  func.func @transform_6(%arg0: i32) -> (i32, i32) {
    %c0_i32 = arith.constant 0 : i32
    %c0_i32_0 = arith.constant 0 : i32
    %c0_i32_1 = arith.constant 0 : i32
    return %c0_i32, %c0_i32_0 : i32, i32
  }
  func.func @transform_7(%arg0: i32) -> (i32, i32) {
    %c0_i32 = arith.constant 0 : i32
    %c0_i32_0 = arith.constant 0 : i32
    %c0_i32_1 = arith.constant 0 : i32
    return %c0_i32, %c0_i32_0 : i32, i32
  }
  func.func @transform_8(%arg0: i32) -> (i32, i32) {
    %c0_i32 = arith.constant 0 : i32
    %c0_i32_0 = arith.constant 0 : i32
    %c0_i32_1 = arith.constant 0 : i32
    return %c0_i32, %c0_i32_0 : i32, i32
  }
  func.func @transform_9(%arg0: i32) -> (i32, i32) {
    %c0_i32 = arith.constant 0 : i32
    %c0_i32_0 = arith.constant 0 : i32
    %c0_i32_1 = arith.constant 0 : i32
    return %c0_i32, %c0_i32_0 : i32, i32
  }
  func.func @transform_10(%arg0: i32) -> (i32, i32) {
    %c0_i32 = arith.constant 0 : i32
    %c0_i32_0 = arith.constant 0 : i32
    %c0_i32_1 = arith.constant 0 : i32
    return %c0_i32, %c0_i32_0 : i32, i32
  }
}

</mosaic_0001>

<bundles_post_ra>
// kernel: tpu_custom_call.1
= control target key start
LH: loop header
LB: loop body
LE: loop exit
PB: predicated region body
PF: predicated region fallthrough
CT: control target
= control target key end

     0   :  { %15 = vsyncpa [#allocation4], 0  ;;  %s3595_s0 = inlined_call_operand.vmem [shape: s32[64,2], index: 0, kind: input, shape index: {}]   ;;  %s3596_s1 = inlined_call_operand.vmem [shape: s32[8,2], index: 1, kind: input, shape index: {}]   ;;  %s3597_s2 = inlined_call_operand.hbm [shape: bf16[256,128], index: 2, kind: input, shape index: {}]   ;;  %s3598_s3 = inlined_call_operand.hbm [shape: bf16[128,512], index: 3, kind: input, shape index: {}]   ;;  %s3599_s4 = inlined_call_operand.hbm [shape: bf16[128,512], index: 4, kind: input, shape index: {}]   ;;  %s3600_s5 = inlined_call_operand.vmem [shape: f32[1,512], index: 5, kind: input, shape index: {}]   ;;  %s3601_s6 = inlined_call_operand.vmem [shape: bf16[128,128], index: 6, kind: input, shape index: {}]   ;;  %s3602_s7 = inlined_call_operand.vmem [shape: f32[1,128], index: 7, kind: input, shape index: {}]   ;;  %s3603_s8 = inlined_call_operand.hbm [shape: bf16[128,128], index: 8, kind: input, shape index: {}]   ;;  %s3604_s9 = inlined_call_operand.vmem [shape: f32[1,128], index: 9, kind: input, shape index: {}]   ;;  %s3605_s10 = inlined_call_operand.hbm [shape: f32[8,128], index: 10, kind: output, shape index: {}]  }
   0x1   :  { %16 = vsyncpa [#allocation7], 0 }
   0x2   :  { %17 = vsyncpa [#allocation10], 0 }
   0x3   :  { %18 = vsyncpa [#allocation5], 0  ;;  %s2748_s13 = smov [#allocation6]   ;;  %s2630_s17 = scalar_lea.hbm %s3598_s3, 4096 }
   0x4   :  { %s40_s14 = sshll.u32 %s2748_s13, 4  ;;  %p2631_p0 = scmp.ne.s32.totalorder %s3598_s3, %s2630_s17  ;;  %s41_s14 = int_to_ptr.vmem [resolvable:$true] %s40_s14 }
   0x5   :  { %p2634_p1 = scmp.lt.u32.totalorder %s2630_s17, %s3598_s3 }
   0x7   :  { %p2636_p2 = pnand %p2634_p1, %p2631_p0 }
   0x9   :  { %2639 = shalt.err (!%p2636_p2)
}
   0xa   :  { %s2640_s22 = scalar_lea.vmem %s41_s14, 4096  ;;  %p2645_p4 = scmp.lt.s32.totalorder %s41_s14, %s41_s14 }
   0xb   :  { %p2641_p3 = scmp.ne.s32.totalorder %s41_s14, %s2640_s22  ;;  %p2646_p5 = scmp.lt.s32.totalorder %s2640_s22, %s2640_s22 }
   0xd   :  { %p2647_p6 = por %p2646_p5, %p2645_p4 }
   0xf   :  { %p2648_p7 = pnand %p2647_p6, %p2641_p3 }
  0x11   :  { %2651 = shalt.err (!%p2648_p7)
}
  0x12   :  { %s2749_s23 = smov 256   ;;  %s2750_s24 = smov 16  }
  0x13   :  { %46 = dma.hbm_to_vmem [thread:$0]  %s3598_s3, 4096, %s41_s14, [#allocation7], %s2749_s23, %s2749_s23, %s2750_s24  }
  0x14   :  { %s2751_s27 = smov [#allocation3]   ;;  %s2652_s11 = scalar_lea.hbm %s3597_s2, 2048 }
  0x15   :  { %s28_s28 = sshll.u32 %s2751_s27, 4  ;;  %p2653_p8 = scmp.ne.s32.totalorder %s3597_s2, %s2652_s11  ;;  %s29_s28 = int_to_ptr.vmem [resolvable:$true] %s28_s28 }
  0x16   :  { %p2656_p9 = scmp.lt.u32.totalorder %s2652_s11, %s3597_s2 }
  0x18   :  { %p2658_p10 = pnand %p2656_p9, %p2653_p8 }
  0x1a   :  { %2661 = shalt.err (!%p2658_p10)
}
  0x1b   :  { %s2662_s17 = scalar_lea.vmem %s29_s28, 2048  ;;  %p2667_p12 = scmp.lt.s32.totalorder %s29_s28, %s29_s28 }
  0x1c   :  { %p2663_p11 = scmp.ne.s32.totalorder %s29_s28, %s2662_s17  ;;  %p2668_p13 = scmp.lt.s32.totalorder %s2662_s17, %s2662_s17 }
  0x1e   :  { %p2669_p0 = por %p2668_p13, %p2667_p12 }
  0x20   :  { %p2670_p1 = pnand %p2669_p0, %p2663_p11 }
  0x22   :  { %2673 = shalt.err (!%p2670_p1)
}
  0x23   :  { %s2752_s3 = smov 64   ;;  %s2753_s14 = smov 4  }
  0x24   :  { %34 = dma.hbm_to_vmem [thread:$0]  %s3597_s2, 2048, %s29_s28, [#allocation4], %s2752_s3, %s2752_s3, %s2753_s14  }
  0x25   :  { %s2754_s20 = smov [#allocation8]   ;;  %s2755_s22 = smov [#allocation9]  }
  0x26   :  { %s52_s21 = sshll.u32 %s2754_s20, 4  ;;  %s70_s25 = sshll.u32 %s2755_s22, 4  ;;  %s53_s21 = int_to_ptr.vmem [resolvable:$true] %s52_s21  ;;  %s2847_s25 = int_to_ptr.vmem [resolvable:$true] %s70_s25 }
  0x27   :  { %s2674_s29 = scalar_lea.hbm %s3599_s4, 4096 }
  0x28   :  { %p2675_p2 = scmp.ne.s32.totalorder %s3599_s4, %s2674_s29  ;;  %p2678_p3 = scmp.lt.u32.totalorder %s2674_s29, %s3599_s4 }
  0x2a   :  { %p2680_p4 = pnand %p2678_p3, %p2675_p2 }
  0x2c   :  { %2683 = shalt.err (!%p2680_p4)
}
  0x2d   :  { %s2684_s2 = scalar_lea.vmem %s53_s21, 4096  ;;  %p2689_p6 = scmp.lt.s32.totalorder %s53_s21, %s53_s21 }
  0x2e   :  { %p2685_p5 = scmp.ne.s32.totalorder %s53_s21, %s2684_s2  ;;  %p2690_p7 = scmp.lt.s32.totalorder %s2684_s2, %s2684_s2 }
  0x30   :  { %p2691_p8 = por %p2690_p7, %p2689_p6 }
  0x32   :  { %p2692_p9 = pnand %p2691_p8, %p2685_p5 }
  0x34   :  { %2695 = shalt.err (!%p2692_p9)
}
  0x35   :  { %58 = dma.hbm_to_vmem [thread:$0]  %s3599_s4, 4096, %s53_s21, [#allocation7], %s2749_s23, %s2749_s23, %s2750_s24  }
  0x36   :  { %s2696_s18 = scalar_lea.hbm %s3603_s8, 1024 }
  0x37   :  { %p2697_p10 = scmp.ne.s32.totalorder %s3603_s8, %s2696_s18  ;;  %p2700_p11 = scmp.lt.u32.totalorder %s2696_s18, %s3603_s8 }
  0x39   :  { %p2702_p12 = pnand %p2700_p11, %p2697_p10 }
  0x3b   :  { %2705 = shalt.err (!%p2702_p12)
}
  0x3c   :  { %s2706_s27 = scalar_lea.vmem %s2847_s25, 1024  ;;  %p2711_p0 = scmp.lt.s32.totalorder %s2847_s25, %s2847_s25 }
  0x3d   :  { %p2707_p13 = scmp.ne.s32.totalorder %s2847_s25, %s2706_s27  ;;  %p2712_p1 = scmp.lt.s32.totalorder %s2706_s27, %s2706_s27 }
  0x3f   :  { %p2713_p2 = por %p2712_p1, %p2711_p0 }
  0x41   :  { %p2714_p3 = pnand %p2713_p2, %p2707_p13 }
  0x43   :  { %2717 = shalt.err (!%p2714_p3)
}
  0x44   :  { %76 = dma.hbm_to_vmem [thread:$0]  %s3603_s8, 1024, %s2847_s25, [#allocation10], %s2752_s3, %s2752_s3, %s2753_s14  }
  0x45   :  { %2740 = dma.done.wait [#allocation4], 2048  }
  0x46   :  { %2741 = vsyncadd [#allocation4], 4294965248 }
  0x47   :  { %2742 = dma.done.wait [#allocation7], 8192  }
  0x48   :  { %2743 = vsyncadd [#allocation7], 4294959104 }
  0x49   :  { %2744 = dma.done.wait [#allocation10], 1024  }
  0x4a   :  { %2745 = vsyncadd [#allocation10], 4294966272  ;;  %v2756_v0 = vmov 1   ;;  %v3606_v1 = vmov 0   ;;  %v95_v2 = vld [vmem:[%s3595_s0] sm:$0xff]  ;;  %v96_v3 = vld [vmem:[%s3595_s0 + $0x8] sm:$0xff]  ;;  %v92_v40 = vlaneseq }
  0x4b   :  { %2377 = vset.pattern.permute.xlu1 %v2756_v0  ;;  %2376 = vset.pattern.permute.xlu0 %v3606_v1  ;;  %v2388_v4 = vld [vmem:[#allocation3 + $0x40] sm:$0xff]   ;;  %v98_v6 = vld [vmem:[%s3595_s0 + $0x18] sm:$0xff]  ;;  %v2390_v7 = vld [vmem:[#allocation3 + $0x48] sm:$0xff]   ;;  %v2758_v50 = vmov 1.0|1.0   ;;  %s2761_s28 = smov [#allocation11]  }
  0x4c   :  { %666 = vmatprep.mubr.bf16.mxu1 %v3606_v1  ;;  %144 = vperm.xlu1 %2377, %v95_v2   ;;  %v2389_v5 = vld [vmem:[#allocation3] sm:$0xff]   ;;  %v97_v8 = vld [vmem:[%s3595_s0 + $0x10] sm:$0xff]  ;;  %v2391_v9 = vld [vmem:[#allocation3 + $0x8] sm:$0xff]   ;;  %v2925_v41 = vand.u32 127, %v92_v40  ;;  %s2139_s15 = sshll.u32 %s2761_s28, 4  ;;  %s2140_s15 = int_to_ptr.vmem [resolvable:$true] %s2139_s15 }
  0x4d   :  { %104 = vperm.xlu0 %2376, %v95_v2   ;;  %2264 = vmatprep.subr.bf16.mxu0 %v2388_v4  ;;  %v2392_v10 = vld [vmem:[#allocation3 + $0x50] sm:$0xff]   ;;  %v2394_v12 = vld [vmem:[#allocation3 + $0x58] sm:$0xff]   ;;  %v100_v13 = vld [vmem:[%s3595_s0 + $0x28] sm:$0xff]  ;;  %p2723_p5 = scmp.lt.s32.totalorder %s2140_s15, %s2140_s15 }
  0x4e   :  { %2265 = vmatpush3.bf16.msra.mxu0 %v2389_v5  ;;  %v2393_v11 = vld [vmem:[#allocation3 + $0x10] sm:$0xff]   ;;  %v99_v14 = vld [vmem:[%s3595_s0 + $0x20] sm:$0xff]  ;;  %v2395_v15 = vld [vmem:[#allocation3 + $0x18] sm:$0xff]   ;;  %v2928_v42 = vadd.s32 128, %v2925_v41 }
  0x4f   :  { %2266 = vmatprep.subr.bf16.mxu0 %v2390_v7  ;;  %v2396_v16 = vld [vmem:[#allocation3 + $0x60] sm:$0xff]   ;;  %v101_v17 = vld [vmem:[%s3595_s0 + $0x30] sm:$0xff]  ;;  %v2398_v19 = vld [vmem:[#allocation3 + $0x68] sm:$0xff]  }
  0x50   :  { %147 = vperm.xlu1 %2377, %v96_v3   ;;  %v2397_v18 = vld [vmem:[#allocation3 + $0x20] sm:$0xff]   ;;  %v2399_v20 = vld [vmem:[#allocation3 + $0x28] sm:$0xff]   ;;  %v2400_v21 = vld [vmem:[#allocation3 + $0x70] sm:$0xff]  }
  0x51   :  { %107 = vperm.xlu0 %2376, %v96_v3   ;;  %v2401_v22 = vld [vmem:[#allocation3 + $0x30] sm:$0xff]   ;;  %v813_v23 = vld [vmem:[%s3596_s1] sm:$0xff]  ;;  %v2402_v24 = vld [vmem:[#allocation3 + $0x78] sm:$0xff]  }
  0x52   :  { %2267 = vmatpush3.bf16.msra.mxu0 %v2391_v9  ;;  %v102_v25 = vld [vmem:[%s3595_s0 + $0x38] sm:$0xff]  ;;  %v2404_v27 = vld [vmem:[#allocation6 + $0x4] ss:$16 sps:$4 sm:$0xff]   ;;  %v2409_v29 = vld [vmem:[#allocation6] ss:$16 sps:$4 sm:$0xff]  }
  0x53   :  { %2268 = vmatprep.subr.bf16.mxu0 %v2392_v10  ;;  %v2403_v26 = vld [vmem:[#allocation3 + $0x38] sm:$0xff]   ;;  %v2410_v30 = vld [vmem:[#allocation6 + $0x24] ss:$16 sps:$4 sm:$0xff]   ;;  %634 = vmatprep.subr.bf16.mxu1 %v2404_v27  ;;  %v2415_v31 = vld [vmem:[#allocation6 + $0x20] ss:$16 sps:$4 sm:$0xff]  }
  0x54   :  { %2378 = vset.pattern.permute.xlu1 %v3606_v1  ;;  %v2408_v28 = vld [vmem:[#allocation6 + $0xc] ss:$16 sps:$4 sm:$0xff]   ;;  %635 = vmatpush1.bf16.msra.mxu1 %v2409_v29  ;;  %v2416_v32 = vld [vmem:[#allocation6 + $0x44] ss:$16 sps:$4 sm:$0xff]   ;;  %v2421_v33 = vld [vmem:[#allocation6 + $0x40] ss:$16 sps:$4 sm:$0xff]  }
  0x55   :  { %2379 = vset.pattern.permute.xlu0 %v2756_v0  ;;  %113 = vperm.xlu1 %2378, %v98_v6   ;;  %v2422_v34 = vld [vmem:[#allocation6 + $0x64] ss:$16 sps:$4 sm:$0xff]   ;;  %v2427_v35 = vld [vmem:[#allocation6 + $0x60] ss:$16 sps:$4 sm:$0xff]   ;;  %v2406_v48 = vld [vmem:[#allocation6 + $0x8] ss:$16 sps:$4 sm:$0xff]  }
  0x56   :  { %150 = vperm.xlu0 %2379, %v97_v8   ;;  %2269 = vmatpush3.bf16.msra.mxu0 %v2393_v11  ;;  %v2428_v36 = vld [vmem:[#allocation6 + $0x84] ss:$16 sps:$4 sm:$0xff]   ;;  %v2433_v37 = vld [vmem:[#allocation6 + $0x80] ss:$16 sps:$4 sm:$0xff]   ;;  %v2414_v49 = vld [vmem:[#allocation6 + $0x2c] ss:$16 sps:$4 sm:$0xff]  }
  0x57   :  { %2270 = vmatprep.subr.bf16.mxu0 %v2394_v12  ;;  %636 = vmatprep.subr.bf16.mxu1 %v2410_v30  ;;  %v2434_v38 = vld [vmem:[#allocation6 + $0xa4] ss:$16 sps:$4 sm:$0xff]   ;;  %v2439_v39 = vld [vmem:[#allocation6 + $0xa0] ss:$16 sps:$4 sm:$0xff]   ;;  %v2412_v53 = vld [vmem:[#allocation6 + $0x28] ss:$16 sps:$4 sm:$0xff]  }
  0x58   :  { %637 = vmatpush1.bf16.msra.mxu1 %v2415_v31  ;;  %v2420_v54 = vld [vmem:[#allocation6 + $0x4c] ss:$16 sps:$4 sm:$0xff]   ;;  %v2418_v57 = vld [vmem:[#allocation6 + $0x48] ss:$16 sps:$4 sm:$0xff]   ;;  %v2440_v11 = vld [vmem:[#allocation6 + $0xc4] ss:$16 sps:$4 sm:$0xff]  }
  0x59   :  { %2381 = vset.pattern.permute.xlu1 %v2756_v0  ;;  %638 = vmatprep.subr.bf16.mxu1 %v2416_v32  ;;  %v2426_v59 = vld [vmem:[#allocation6 + $0x6c] ss:$16 sps:$4 sm:$0xff]   ;;  %v2424_v61 = vld [vmem:[#allocation6 + $0x68] ss:$16 sps:$4 sm:$0xff]   ;;  %v2999_v30 = vld [vmem:[#allocation8 + $0x24] ss:$16 sps:$4 sm:$0xff]  }
  0x5a   :  { %2380 = vset.pattern.permute.xlu0 %v3606_v1  ;;  %153 = vperm.xlu1 %2381, %v98_v6   ;;  %v2432_v63 = vld [vmem:[#allocation6 + $0x8c] ss:$16 sps:$4 sm:$0xff]   ;;  %v2436_v5 = vld [vmem:[#allocation6 + $0xa8] ss:$16 sps:$4 sm:$0xff]   ;;  %v3007_v32 = vld [vmem:[#allocation8 + $0x20] ss:$16 sps:$4 sm:$0xff]  }
  0x5b   :  { %110 = vperm.xlu0 %2380, %v97_v8   ;;  %2271 = vmatpush3.bf16.msra.mxu0 %v2395_v15  ;;  %v2438_v3 = vld [vmem:[#allocation6 + $0xac] ss:$16 sps:$4 sm:$0xff]   ;;  %v2442_v12 = vld [vmem:[#allocation6 + $0xc8] ss:$16 sps:$4 sm:$0xff]   ;;  %v2446_v15 = vld [vmem:[#allocation6 + $0xe4] ss:$16 sps:$4 sm:$0xff]  }
  0x5c   :  { %2272 = vmatprep.subr.bf16.mxu0 %v2396_v16  ;;  %639 = vmatpush1.bf16.msra.mxu1 %v2421_v33  ;;  %v2450_v16 = vld [vmem:[#allocation6 + $0xec] ss:$16 sps:$4 sm:$0xff]   ;;  %v2997_v29 = vld [vmem:[#allocation8 + $0x8] ss:$16 sps:$4 sm:$0xff]   ;;  %v3025_v45 = vld [vmem:[#allocation8 + $0x64] ss:$16 sps:$4 sm:$0xff]  }
  0x5d   :  { %640 = vmatprep.subr.bf16.mxu1 %v2422_v34  ;;  %v3001_v31 = vld [vmem:[#allocation8 + $0x2c] ss:$16 sps:$4 sm:$0xff]   ;;  %v3009_v33 = vld [vmem:[#allocation8 + $0x28] ss:$16 sps:$4 sm:$0xff]   ;;  %v3013_v34 = vld [vmem:[#allocation8 + $0x44] ss:$16 sps:$4 sm:$0xff]  }
  0x5e   :  { %2382 = vset.pattern.permute.xlu1 %v3606_v1  ;;  %v3075_v7 = vld [vmem:[#allocation8 + $0xe4] ss:$16 sps:$4 sm:$0xff]  }
  0x5f   :  { %119 = vperm.xlu0 %2380, %v100_v13   ;;  %116 = vperm.xlu1 %2382, %v99_v14  }
  0x60   :  { %2273 = vmatpush3.bf16.msra.mxu0 %v2397_v18  ;;  %641 = vmatpush1.bf16.msra.mxu1 %v2427_v35  ;;  %v2451_v18 = vld [vmem:[#allocation6 + $0xe0] ss:$16 sps:$4 sm:$0xff]   ;;  %v3015_v35 = vld [vmem:[#allocation8 + $0x4c] ss:$16 sps:$4 sm:$0xff]  }
  0x61   :  { %2274 = vmatprep.subr.bf16.mxu0 %v2398_v19  ;;  %642 = vmatprep.subr.bf16.mxu1 %v2428_v36  ;;  %v2989_v19 = vld [vmem:[#allocation8 + $0x4] ss:$16 sps:$4 sm:$0xff]  }
  0x63   :  { %122 = vperm.xlu0 %2380, %v101_v17   ;;  %2383 = vset.pattern.permute.xlu1 %v2756_v0 }
  0x64   :  { %156 = vperm.xlu1 %2383, %v99_v14   ;;  %2275 = vmatpush3.bf16.msra.mxu0 %v2399_v20  ;;  %v2445_v14 = vld [vmem:[#allocation6 + $0xc0] ss:$16 sps:$4 sm:$0xff]   ;;  %v2991_v20 = vld [vmem:[#allocation8 + $0xc] ss:$16 sps:$4 sm:$0xff]  }
  0x65   :  { %2276 = vmatprep.subr.bf16.mxu0 %v2400_v21  ;;  %643 = vmatpush1.bf16.msra.mxu1 %v2433_v37 }
  0x66   :  { %644 = vmatprep.subr.bf16.mxu1 %v2434_v38 }
  0x67   :  { %2385 = vset.pattern.permute.xlu0 %v2756_v0 }
  0x68   :  { %162 = vperm.xlu0 %2385, %v101_v17   ;;  %159 = vperm.xlu1 %2383, %v100_v13   ;;  %v2444_v13 = vld [vmem:[#allocation6 + $0xcc] ss:$16 sps:$4 sm:$0xff]   ;;  %v2448_v17 = vld [vmem:[#allocation6 + $0xe8] ss:$16 sps:$4 sm:$0xff]  }
  0x69   :  { %2277 = vmatpush3.bf16.msra.mxu0 %v2401_v22  ;;  %645 = vmatpush1.bf16.msra.mxu1 %v2439_v39 }
  0x6a   :  { %2278 = vmatprep.subr.bf16.mxu0 %v2402_v24  ;;  %646 = vmatprep.subr.bf16.mxu1 %v2440_v11  ;;  %v3083_v11 = vld [vmem:[#allocation8 + $0xe0] ss:$16 sps:$4 sm:$0xff]  }
  0x6c   :  { %818 = vperm.xlu0 %2385, %v813_v23   ;;  %2384 = vset.pattern.permute.xlu1 %v3606_v1 }
  0x6d   :  { %125 = vperm.xlu1 %2384, %v102_v25   ;;  %2279 = vmatpush3.bf16.msra.mxu0 %v2403_v26 }
  0x6e   :  { %707 = vmatprep.subr.bf16.mxu0 %v2408_v28  ;;  %647 = vmatpush1.bf16.msra.mxu1 %v2445_v14  ;;  %v2995_v28 = vld [vmem:[#allocation8] ss:$16 sps:$4 sm:$0xff]  }
  0x6f   :  { %648 = vmatprep.subr.bf16.mxu1 %v2446_v15 }
  0x71   :  { %2386 = vset.pattern.permute.xlu1 %v2756_v0  ;;  %v2430_v0 = vld [vmem:[#allocation6 + $0x88] ss:$16 sps:$4 sm:$0xff]  }
  0x72   :  { %165 = vperm.xlu1 %2386, %v102_v25   ;;  %649 = vmatpush1.bf16.msra.mxu1 %v2451_v18  ;;  %v455_v18 = vshrl.u32 %v92_v40, 7 }
  0x73   :  { %1017 = vmatprep.subr.bf16.mxu1 %v2989_v19 }
  0x76   :  { %2387 = vset.pattern.permute.xlu1 %v3606_v1 }
  0x77   :  { %815 = vperm.xlu1 %2387, %v813_v23  }
  0xcb   :  { %v145_v43 = vpop.permute.xlu1 %144 }
  0xcc   :  { %v105_v44 = vpop.permute.xlu0 %104  ;;  %vm167_vm0 = vcmp.eq.s32.totalorder %v2925_v41, %v145_v43  ;;  %vm168_vm2 = vcmp.eq.s32.totalorder %v2928_v42, %v145_v43  ;;  %v3021_v43 = vld [vmem:[#allocation8 + $0x48] ss:$16 sps:$4 sm:$0xff]  }
  0xcd   :  { %vm127_vm1 = vcmp.eq.s32.totalorder %v2925_v41, %v105_v44  ;;  %vm128_vm3 = vcmp.eq.s32.totalorder %v2928_v42, %v105_v44 }
  0xce   :  { %vm2934_vm4 = vmor %vm127_vm1, %vm167_vm0 }
  0xcf   :  { %v148_v46 = vpop.permute.xlu1 %147  ;;  %vm184_vm9 = vmor %vm128_vm3, %vm168_vm2 }
  0xd0   :  { %v108_v47 = vpop.permute.xlu0 %107  ;;  %vm169_vm5 = vcmp.eq.s32.totalorder %v2925_v41, %v148_v46  ;;  %vm170_vm6 = vcmp.eq.s32.totalorder %v2928_v42, %v148_v46  ;;  %v3027_v46 = vld [vmem:[#allocation8 + $0x6c] ss:$16 sps:$4 sm:$0xff]  }
  0xd1   :  { %vm129_vm7 = vcmp.eq.s32.totalorder %v2925_v41, %v108_v47  ;;  %vm130_vm8 = vcmp.eq.s32.totalorder %v2928_v42, %v108_v47 }
  0xd2   :  { %vm185_vm10 = vmor %vm129_vm7, %vm169_vm5 }
  0xd3   :  { %vm186_vm11 = vmor %vm130_vm8, %vm170_vm6 }
  0xd4   :  { %vm2166_vm12 = vmpackc.low %vm186_vm11, %vm184_vm9  ;;  %v114_v51 = vpop.permute.xlu1 %113 }
  0xd5   :  { %2167 = vmatprep.mubr.msk.bf16.mxu0 %vm2166_vm12, %v2758_v50  ;;  %vm2168_vm13 = vmpackc.low %vm185_vm10, %vm2934_vm4  ;;  %v151_v52 = vpop.permute.xlu0 %150  ;;  %vm133_vm14 = vcmp.eq.s32.totalorder %v2925_v41, %v114_v51  ;;  %vm134_vm3 = vcmp.eq.s32.totalorder %v2928_v42, %v114_v51  ;;  %v3037_v51 = vld [vmem:[#allocation8 + $0x84] ss:$16 sps:$4 sm:$0xff]  }
  0xd6   :  { %2169 = vmatmul.mubr.msk.bf16.vlgmr.msra.gmra.mrb[0].mxu0 %vm2168_vm13, %v2758_v50  ;;  %vm171_vm15 = vcmp.eq.s32.totalorder %v2925_v41, %v151_v52  ;;  %vm172_vm4 = vcmp.eq.s32.totalorder %v2928_v42, %v151_v52  ;;  %v3039_v52 = vld [vmem:[#allocation8 + $0x8c] ss:$16 sps:$4 sm:$0xff]  }
  0xd7   :  { %708 = vmatpush1.bf16.msra.mxu0 %v2406_v48 }
  0xd8   :  { %709 = vmatprep.subr.bf16.mxu0 %v2414_v49  ;;  %v3031_v49 = vld [vmem:[#allocation8 + $0x60] ss:$16 sps:$4 sm:$0xff]  }
  0xd9   :  { %v154_v55 = vpop.permute.xlu1 %153 }
  0xda   :  { %v111_v56 = vpop.permute.xlu0 %110  ;;  %vm173_vm0 = vcmp.eq.s32.totalorder %v2925_v41, %v154_v55  ;;  %vm174_vm1 = vcmp.eq.s32.totalorder %v2928_v42, %v154_v55  ;;  %v3051_v55 = vld [vmem:[#allocation8 + $0xa4] ss:$16 sps:$4 sm:$0xff]  }
  0xdb   :  { %vm131_vm2 = vcmp.eq.s32.totalorder %v2925_v41, %v111_v56  ;;  %710 = vmatpush1.bf16.msra.mxu0 %v2412_v53  ;;  %vm2953_vm5 = vmor %vm133_vm14, %vm173_vm0  ;;  %vm132_vm6 = vcmp.eq.s32.totalorder %v2928_v42, %v111_v56  ;;  %v3045_v53 = vld [vmem:[#allocation8 + $0x80] ss:$16 sps:$4 sm:$0xff]   ;;  %v3053_v56 = vld [vmem:[#allocation8 + $0xac] ss:$16 sps:$4 sm:$0xff]  }
  0xdc   :  { %711 = vmatprep.subr.bf16.mxu0 %v2420_v54  ;;  %vm190_vm7 = vmor %vm134_vm3, %vm174_vm1  ;;  %v3047_v54 = vld [vmem:[#allocation8 + $0x88] ss:$16 sps:$4 sm:$0xff]  }
  0xdd   :  { %vm187_vm8 = vmor %vm131_vm2, %vm171_vm15 }
  0xde   :  { %vm188_vm9 = vmor %vm132_vm6, %vm172_vm4  ;;  %v117_v60 = vpop.permute.xlu1 %116  ;;  %v120_v62 = vpop.permute.xlu0 %119 }
  0xdf   :  { %712 = vmatpush1.bf16.msra.mxu0 %v2418_v57  ;;  %vm2170_vm10 = vmpackc.low %vm190_vm7, %vm188_vm9  ;;  %vm135_vm14 = vcmp.eq.s32.totalorder %v2925_v41, %v117_v60  ;;  %vm136_vm15 = vcmp.eq.s32.totalorder %v2928_v42, %v117_v60  ;;  %vm137_vm3 = vcmp.eq.s32.totalorder %v2925_v41, %v120_v62  ;;  %v3059_v60 = vld [vmem:[#allocation8 + $0xa8] ss:$16 sps:$4 sm:$0xff]  }
  0xe0   :  { %713 = vmatprep.subr.bf16.mxu0 %v2426_v59  ;;  %2171 = vmatprep.mubr.msk.bf16.mxu0 %vm2170_vm10, %v2758_v50  ;;  %vm2172_vm11 = vmpackc.low %vm2953_vm5, %vm187_vm8  ;;  %vm138_vm5 = vcmp.eq.s32.totalorder %v2928_v42, %v120_v62  ;;  %v3057_v59 = vld [vmem:[#allocation8 + $0xa0] ss:$16 sps:$4 sm:$0xff]  }
  0xe1   :  { %2173 = vmatmul.mubr.msk.bf16.gmra.mrb[4].mxu0 %vm2172_vm11, %v2758_v50 }
  0xe2   :  { %v123_v4 = vpop.permute.xlu0 %122 }
  0xe3   :  { %714 = vmatpush1.bf16.msra.mxu0 %v2424_v61  ;;  %v157_v2 = vpop.permute.xlu1 %156 }
  0xe4   :  { %715 = vmatprep.subr.bf16.mxu0 %v2432_v63  ;;  %vm175_vm12 = vcmp.eq.s32.totalorder %v2925_v41, %v157_v2  ;;  %vm176_vm13 = vcmp.eq.s32.totalorder %v2928_v42, %v157_v2  ;;  %v3063_v63 = vld [vmem:[#allocation8 + $0xc4] ss:$16 sps:$4 sm:$0xff]  }
  0xe5   :  { %vm2966_vm0 = vmor %vm135_vm14, %vm175_vm12  ;;  %vm139_vm12 = vcmp.eq.s32.totalorder %v2925_v41, %v123_v4 }
  0xe6   :  { %vm192_vm4 = vmor %vm136_vm15, %vm176_vm13  ;;  %vm140_vm13 = vcmp.eq.s32.totalorder %v2928_v42, %v123_v4 }
  0xe7   :  { %716 = vmatpush1.bf16.msra.mxu0 %v2430_v0  ;;  %v160_v6 = vpop.permute.xlu1 %159  ;;  %v163_v8 = vpop.permute.xlu0 %162  ;;  %v3065_v0 = vld [vmem:[#allocation8 + $0xcc] ss:$16 sps:$4 sm:$0xff]  }
  0xe8   :  { %717 = vmatprep.subr.bf16.mxu0 %v2438_v3  ;;  %vm177_vm1 = vcmp.eq.s32.totalorder %v2925_v41, %v160_v6  ;;  %vm178_vm2 = vcmp.eq.s32.totalorder %v2928_v42, %v160_v6  ;;  %vm179_vm10 = vcmp.eq.s32.totalorder %v2925_v41, %v163_v8  ;;  %vm180_vm11 = vcmp.eq.s32.totalorder %v2928_v42, %v163_v8  ;;  %v3073_v6 = vld [vmem:[#allocation8 + $0xc8] ss:$16 sps:$4 sm:$0xff]   ;;  %v3077_v8 = vld [vmem:[#allocation8 + $0xec] ss:$16 sps:$4 sm:$0xff]  }
  0xe9   :  { %vm193_vm6 = vmor %vm137_vm3, %vm177_vm1 }
  0xea   :  { %vm194_vm7 = vmor %vm138_vm5, %vm178_vm2 }
  0xeb   :  { %718 = vmatpush1.bf16.msra.mxu0 %v2436_v5  ;;  %vm2174_vm8 = vmpackc.low %vm194_vm7, %vm192_vm4  ;;  %v3070_v5 = vld [vmem:[#allocation8 + $0xc0] ss:$16 sps:$4 sm:$0xff]  }
  0xec   :  { %v126_v9 = vpop.permute.xlu1 %125  ;;  %2175 = vmatprep.mubr.msk.bf16.mxu0 %vm2174_vm8, %v2758_v50  ;;  %vm2176_vm9 = vmpackc.low %vm193_vm6, %vm2966_vm0  ;;  %719 = vmatprep.subr.bf16.mxu0 %v2444_v13  ;;  %vm812_vm8 = vcmp.lt.s32.totalorder %v2925_v41, 64 }
  0xed   :  { %2177 = vmatmul.mubr.msk.bf16.gmra.mrb[8].mxu0 %vm2176_vm9, %v2758_v50  ;;  %vm195_vm14 = vmor %vm139_vm12, %vm179_vm10  ;;  %vm141_vm1 = vcmp.eq.s32.totalorder %v2925_v41, %v126_v9  ;;  %vm142_vm0 = vcmp.eq.s32.totalorder %v2928_v42, %v126_v9 }
  0xee   :  { %vm196_vm15 = vmor %vm140_vm13, %vm180_vm11 }
  0xef   :  { %720 = vmatpush1.bf16.msra.mxu0 %v2442_v12  ;;  %v3085_v12 = vld [vmem:[#allocation8 + $0xe8] ss:$16 sps:$4 sm:$0xff]  }
  0xf0   :  { %721 = vmatprep.subr.bf16.mxu0 %v2450_v16 }
  0xf1   :  { %v166_v10 = vpop.permute.xlu1 %165 }
  0xf2   :  { %vm181_vm2 = vcmp.eq.s32.totalorder %v2925_v41, %v166_v10  ;;  %vm182_vm3 = vcmp.eq.s32.totalorder %v2928_v42, %v166_v10  ;;  %v3019_v42 = vld [vmem:[#allocation8 + $0x40] ss:$16 sps:$4 sm:$0xff]  }
  0xf3   :  { %vm197_vm4 = vmor %vm141_vm1, %vm181_vm2  ;;  %722 = vmatpush1.bf16.msra.mxu0 %v2448_v17  ;;  %vm2760_vm1 = vmmov 0  }
  0xf4   :  { %vm198_vm5 = vmor %vm142_vm0, %vm182_vm3  ;;  %1058 = vmatprep.subr.bf16.mxu0 %v2991_v20 }
  0xf5   :  { %vm2178_vm6 = vmpackc.low %vm198_vm5, %vm196_vm15 }
  0xf6   :  { %2179 = vmatprep.mubr.msk.bf16.mxu0 %vm2178_vm6, %v2758_v50  ;;  %vm2180_vm7 = vmpackc.low %vm197_vm4, %vm195_vm14 }
  0xf7   :  { %2181 = vmatmul.mubr.msk.bf16.gmra.mrb[12].mxu0 %vm2180_vm7, %v2758_v50  ;;  %v3033_v50 = vld [vmem:[#allocation8 + $0x68] ss:$16 sps:$4 sm:$0xff]  }
  0xf8   :  { %739 = vmatprep.mubr.bf16.mxu0 %v3606_v1 }
 0x1a9   :  { %v2280_v21 = vpop.f32.mrb[0].mxu0 }
 0x1aa   :  { %v2281_v22 = vpop.f32.mrb[1].mxu0 }
 0x1ab   :  { %v2282_v23 = vadd.f32 %v2281_v22, %v2280_v21  ;;  %v2283_v24 = vpop.f32.mrb[2].mxu0  ;;  %v456_v21 = vsub.s32 0, %v455_v18  ;;  %v464_v22 = vsub.s32 2, %v455_v18 }
 0x1ac   :  { %v2284_v25 = vpop.f32.mrb[3].mxu0 }
 0x1ad   :  { %v2285_v26 = vadd.f32 %v2284_v25, %v2283_v24  ;;  %v460_v24 = vsub.s32 1, %v455_v18  ;;  %v468_v25 = vsub.s32 3, %v455_v18 }
 0x1af   :  { %v416_v27 = vpack.c.bf16 %v2285_v26, %v2282_v23  ;;  %v452_v23 = vld [vmem:[%s3600_s5] sm:$0xf] }
 0x1b1   :  { %667 = vmatmul.mubr.bf16.vlgmr.msra.gmra.mrb[0].mxu1 %v416_v27  ;;  %740 = vmatmul.mubr.bf16.vlgmr.msra.gmra.mrb[16].mxu0 %v416_v27 }
 0x1b2   :  { %676 = vmatprep.mubr.bf16.mxu1 %v3606_v1  ;;  %749 = vmatprep.mubr.bf16.mxu0 %v3606_v1 }
 0x1b3   :  { %1018 = vmatpush1.bf16.msra.mxu1 %v2995_v28  ;;  %1059 = vmatpush1.bf16.msra.mxu0 %v2997_v29 }
 0x1b4   :  { %1019 = vmatprep.subr.bf16.mxu1 %v2999_v30  ;;  %1060 = vmatprep.subr.bf16.mxu0 %v3001_v31  ;;  %v2286_v36 = vpop.f32.mrb[4].mxu0 }
 0x1b5   :  { %v2287_v37 = vpop.f32.mrb[5].mxu0 }
 0x1b6   :  { %v2288_v38 = vadd.f32 %v2287_v37, %v2286_v36  ;;  %v2289_v39 = vpop.f32.mrb[6].mxu0  ;;  %v457_v36 = vrot.slane %v452_v23, %v456_v21  ;;  %v465_v37 = vrot.slane %v452_v23, %v464_v22 }
 0x1b7   :  { %1020 = vmatpush1.bf16.msra.mxu1 %v3007_v32  ;;  %1061 = vmatpush1.bf16.msra.mxu0 %v3009_v33  ;;  %v2290_v44 = vpop.f32.mrb[7].mxu0 }
 0x1b8   :  { %1021 = vmatprep.subr.bf16.mxu1 %v3013_v34  ;;  %1062 = vmatprep.subr.bf16.mxu0 %v3015_v35  ;;  %v2291_v47 = vadd.f32 %v2290_v44, %v2289_v39  ;;  %v461_v44 = vrot.slane %v452_v23, %v460_v24 }
 0x1ba   :  { %v417_v48 = vpack.c.bf16 %v2291_v47, %v2288_v38  ;;  %v469_v47 = vrot.slane %v452_v23, %v468_v25 }
 0x1bb   :  { %1022 = vmatpush1.bf16.msra.mxu1 %v3019_v42  ;;  %1063 = vmatpush1.bf16.msra.mxu0 %v3021_v43 }
 0x1bc   :  { %1023 = vmatprep.subr.bf16.mxu1 %v3025_v45  ;;  %1064 = vmatprep.subr.bf16.mxu0 %v3027_v46 }
 0x1bd   :  { %677 = vmatmul.mubr.bf16.gmra.mrb[4].mxu1 %v417_v48  ;;  %750 = vmatmul.mubr.bf16.gmra.mrb[20].mxu0 %v417_v48 }
 0x1be   :  { %686 = vmatprep.mubr.bf16.mxu1 %v3606_v1  ;;  %759 = vmatprep.mubr.bf16.mxu0 %v3606_v1 }
 0x1bf   :  { %1024 = vmatpush1.bf16.msra.mxu1 %v3031_v49  ;;  %1065 = vmatpush1.bf16.msra.mxu0 %v3033_v50 }
 0x1c0   :  { %1025 = vmatprep.subr.bf16.mxu1 %v3037_v51  ;;  %1066 = vmatprep.subr.bf16.mxu0 %v3039_v52  ;;  %v2292_v57 = vpop.f32.mrb[8].mxu0 }
 0x1c1   :  { %v2293_v58 = vpop.f32.mrb[9].mxu0 }
 0x1c2   :  { %v2294_v61 = vadd.f32 %v2293_v58, %v2292_v57  ;;  %v2295_v62 = vpop.f32.mrb[10].mxu0 }
 0x1c3   :  { %1026 = vmatpush1.bf16.msra.mxu1 %v3045_v53  ;;  %1067 = vmatpush1.bf16.msra.mxu0 %v3047_v54  ;;  %v2296_v2 = vpop.f32.mrb[11].mxu0 }
 0x1c4   :  { %1027 = vmatprep.subr.bf16.mxu1 %v3051_v55  ;;  %1068 = vmatprep.subr.bf16.mxu0 %v3053_v56  ;;  %v2297_v3 = vadd.f32 %v2296_v2, %v2295_v62 }
 0x1c6   :  { %v418_v4 = vpack.c.bf16 %v2297_v3, %v2294_v61 }
 0x1c7   :  { %1028 = vmatpush1.bf16.msra.mxu1 %v3057_v59  ;;  %1069 = vmatpush1.bf16.msra.mxu0 %v3059_v60 }
 0x1c8   :  { %1029 = vmatprep.subr.bf16.mxu1 %v3063_v63  ;;  %1070 = vmatprep.subr.bf16.mxu0 %v3065_v0 }
 0x1c9   :  { %687 = vmatmul.mubr.bf16.gmra.mrb[8].mxu1 %v418_v4  ;;  %760 = vmatmul.mubr.bf16.gmra.mrb[24].mxu0 %v418_v4 }
 0x1ca   :  { %v2298_v9 = vpop.f32.mrb[12].mxu0  ;;  %696 = vmatprep.mubr.bf16.mxu1 %v3606_v1  ;;  %769 = vmatprep.mubr.bf16.mxu0 %v3606_v1 }
 0x1cb   :  { %v2299_v10 = vpop.f32.mrb[13].mxu0  ;;  %1030 = vmatpush1.bf16.msra.mxu1 %v3070_v5  ;;  %1071 = vmatpush1.bf16.msra.mxu0 %v3073_v6 }
 0x1cc   :  { %v2300_v13 = vadd.f32 %v2299_v10, %v2298_v9  ;;  %v2301_v14 = vpop.f32.mrb[14].mxu0  ;;  %1031 = vmatprep.subr.bf16.mxu1 %v3075_v7  ;;  %1072 = vmatprep.subr.bf16.mxu0 %v3077_v8 }
 0x1cd   :  { %v2302_v15 = vpop.f32.mrb[15].mxu0 }
 0x1ce   :  { %v2303_v16 = vadd.f32 %v2302_v15, %v2301_v14 }
 0x1cf   :  { %1032 = vmatpush1.bf16.msra.mxu1 %v3083_v11  ;;  %1073 = vmatpush1.bf16.msra.mxu0 %v3085_v12 }
 0x1d0   :  { %v419_v17 = vpack.c.bf16 %v2303_v16, %v2300_v13  ;;  %1129 = vmatprep.subr.bf16.mxu1 %v2989_v19  ;;  %1170 = vmatprep.subr.bf16.mxu0 %v2991_v20 }
 0x1d2   :  { %697 = vmatmul.mubr.bf16.gmra.mrb[12].mxu1 %v419_v17  ;;  %770 = vmatmul.mubr.bf16.gmra.mrb[28].mxu0 %v419_v17 }
 0x1d3   :  { %1049 = vmatprep.mubr.bf16.mxu1 %v3606_v1  ;;  %1090 = vmatprep.mubr.bf16.mxu0 %v3606_v1 }
 0x1da   :  { %1050 = vmatmul.mubr.bf16.vlgmr.msra.gmra.mrb[16].mxu1 %v3606_v1  ;;  %1091 = vmatmul.mubr.bf16.vlgmr.msra.gmra.mrb[32].mxu0 %v3606_v1 }
 0x1db   :  { %1130 = vmatpush1.bf16.msra.mxu1 %v2995_v28  ;;  %1171 = vmatpush1.bf16.msra.mxu0 %v2997_v29 }
 0x1dc   :  { %1131 = vmatprep.subr.bf16.mxu1 %v2999_v30  ;;  %1172 = vmatprep.subr.bf16.mxu0 %v3001_v31 }
 0x1dd   :  { %1161 = vmatprep.mubr.bf16.mxu1 %v3606_v1  ;;  %1202 = vmatprep.mubr.bf16.mxu0 %v3606_v1 }
 0x1df   :  { %1132 = vmatpush1.bf16.msra.mxu1 %v3007_v32  ;;  %1173 = vmatpush1.bf16.msra.mxu0 %v3009_v33 }
 0x1e0   :  { %1133 = vmatprep.subr.bf16.mxu1 %v3013_v34  ;;  %1174 = vmatprep.subr.bf16.mxu0 %v3015_v35 }
 0x1e3   :  { %1134 = vmatpush1.bf16.msra.mxu1 %v3019_v42  ;;  %1175 = vmatpush1.bf16.msra.mxu0 %v3021_v43 }
 0x1e4   :  { %1135 = vmatprep.subr.bf16.mxu1 %v3025_v45  ;;  %1176 = vmatprep.subr.bf16.mxu0 %v3027_v46 }
 0x1e7   :  { %1136 = vmatpush1.bf16.msra.mxu1 %v3031_v49  ;;  %1177 = vmatpush1.bf16.msra.mxu0 %v3033_v50 }
 0x1e8   :  { %1137 = vmatprep.subr.bf16.mxu1 %v3037_v51  ;;  %1178 = vmatprep.subr.bf16.mxu0 %v3039_v52 }
 0x1eb   :  { %1138 = vmatpush1.bf16.msra.mxu1 %v3045_v53  ;;  %1179 = vmatpush1.bf16.msra.mxu0 %v3047_v54 }
 0x1ec   :  { %1139 = vmatprep.subr.bf16.mxu1 %v3051_v55  ;;  %1180 = vmatprep.subr.bf16.mxu0 %v3053_v56 }
 0x1ef   :  { %1140 = vmatpush1.bf16.msra.mxu1 %v3057_v59  ;;  %1181 = vmatpush1.bf16.msra.mxu0 %v3059_v60 }
 0x1f0   :  { %1141 = vmatprep.subr.bf16.mxu1 %v3063_v63  ;;  %1182 = vmatprep.subr.bf16.mxu0 %v3065_v0 }
 0x1f3   :  { %1142 = vmatpush1.bf16.msra.mxu1 %v3070_v5  ;;  %1183 = vmatpush1.bf16.msra.mxu0 %v3073_v6 }
 0x1f4   :  { %1143 = vmatprep.subr.bf16.mxu1 %v3075_v7  ;;  %1184 = vmatprep.subr.bf16.mxu0 %v3077_v8 }
 0x1f7   :  { %1144 = vmatpush1.bf16.msra.mxu1 %v3083_v11  ;;  %1185 = vmatpush1.bf16.msra.mxu0 %v3085_v12 }
 0x1f8   :  { %1241 = vmatprep.subr.bf16.mxu1 %v2989_v19  ;;  %1282 = vmatprep.subr.bf16.mxu0 %v2991_v20 }
 0x284   :  { %v3135_v26 = vpop.f32.mrb[0].mxu1  ;;  %v3137_v27 = vpop.f32.mrb[16].mxu0 }
 0x285   :  { %v670_v38 = vpop.f32.mrb[1].mxu1  ;;  %v743_v39 = vpop.f32.mrb[17].mxu0 }
 0x286   :  { %v672_v48 = vpop.f32.mrb[2].mxu1  ;;  %v745_v40 = vpop.f32.mrb[18].mxu0 }
 0x287   :  { %v3139_v57 = vadd.f32 %v672_v48, %v457_v36  ;;  %v3141_v58 = vadd.f32 %v745_v40, %v465_v37  ;;  %v674_v61 = vpop.f32.mrb[3].mxu1  ;;  %v747_v62 = vpop.f32.mrb[19].mxu0 }
 0x288   :  { %v3143_v2 = vadd.f32 %v674_v61, %v461_v44  ;;  %v3145_v3 = vadd.f32 %v747_v62, %v469_v47 }
 0x290   :  { %v678_v4 = vpop.f32.mrb[4].mxu1  ;;  %v751_v9 = vpop.f32.mrb[20].mxu0 }
 0x291   :  { %v3147_v10 = vadd.f32 %v678_v4, %v457_v36  ;;  %v3149_v13 = vadd.f32 %v751_v9, %v465_v37  ;;  %v680_v14 = vpop.f32.mrb[5].mxu1  ;;  %v753_v15 = vpop.f32.mrb[21].mxu0 }
 0x292   :  { %v3151_v16 = vadd.f32 %v680_v14, %v461_v44  ;;  %v3153_v17 = vadd.f32 %v753_v15, %v469_v47  ;;  %v682_v18 = vpop.f32.mrb[6].mxu1  ;;  %v755_v21 = vpop.f32.mrb[22].mxu0 }
 0x293   :  { %3614 = vst [vmem:[#allocation16_spill] sm:$0xff] %v3149_v13  ;;  %v3155_v22 = vadd.f32 %v682_v18, %v457_v36  ;;  %v3157_v23 = vadd.f32 %v755_v21, %v465_v37  ;;  %v684_v24 = vpop.f32.mrb[7].mxu1  ;;  %v757_v25 = vpop.f32.mrb[23].mxu0 }
 0x294   :  { %3615 = vst [vmem:[#allocation17_spill] sm:$0xff] %v3151_v16  ;;  %3616 = vst [vmem:[#allocation18_spill] sm:$0xff] %v3153_v17  ;;  %v3159_v48 = vadd.f32 %v684_v24, %v461_v44  ;;  %v3161_v40 = vadd.f32 %v757_v25, %v469_v47 }
 0x295   :  { %3617 = vst [vmem:[#allocation19_spill] sm:$0xff] %v3155_v22  ;;  %3618 = vst [vmem:[#allocation20_spill] sm:$0xff] %v3157_v23 }
 0x296   :  { %3619 = vst [vmem:[#allocation21_spill] sm:$0xff] %v3159_v48  ;;  %3620 = vst [vmem:[#allocation22_spill] sm:$0xff] %v3161_v40 }
 0x29c   :  { %v688_v61 = vpop.f32.mrb[8].mxu1  ;;  %v761_v62 = vpop.f32.mrb[24].mxu0 }
 0x29d   :  { %v3163_v4 = vadd.f32 %v688_v61, %v457_v36  ;;  %v3165_v9 = vadd.f32 %v761_v62, %v465_v37  ;;  %v690_v14 = vpop.f32.mrb[9].mxu1  ;;  %v763_v15 = vpop.f32.mrb[25].mxu0 }
 0x29e   :  { %v3167_v1 = vadd.f32 %v690_v14, %v461_v44  ;;  %v3169_v18 = vadd.f32 %v763_v15, %v469_v47  ;;  %v692_v21 = vpop.f32.mrb[10].mxu1  ;;  %v765_v23 = vpop.f32.mrb[26].mxu0 }
 0x29f   :  { %3621 = vst [vmem:[#allocation23_spill] sm:$0xff] %v3163_v4  ;;  %3622 = vst [vmem:[#allocation24_spill] sm:$0xff] %v3165_v9  ;;  %v3171_v22 = vadd.f32 %v692_v21, %v457_v36  ;;  %v3173_v24 = vadd.f32 %v765_v23, %v465_v37  ;;  %v694_v25 = vpop.f32.mrb[11].mxu1  ;;  %v767_v40 = vpop.f32.mrb[27].mxu0 }
 0x2a0   :  { %3623 = vst [vmem:[#allocation25_spill] sm:$0xff] %v3167_v1  ;;  %3624 = vst [vmem:[#allocation26_spill] sm:$0xff] %v3169_v18  ;;  %v3175_v48 = vadd.f32 %v694_v25, %v461_v44  ;;  %v3177_v61 = vadd.f32 %v767_v40, %v469_v47 }
 0x2a1   :  { %3625 = vst [vmem:[#allocation27_spill] sm:$0xff] %v3171_v22  ;;  %3626 = vst [vmem:[#allocation28_spill] sm:$0xff] %v3173_v24 }
 0x2a2   :  { %3627 = vst [vmem:[#allocation29_spill] sm:$0xff] %v3175_v48  ;;  %3628 = vst [vmem:[#allocation30_spill] sm:$0xff] %v3177_v61 }
 0x2a5   :  { %v698_v62 = vpop.f32.mrb[12].mxu1  ;;  %v771_v9 = vpop.f32.mrb[28].mxu0 }
 0x2a6   :  { %v3179_v4 = vadd.f32 %v698_v62, %v457_v36  ;;  %v3181_v14 = vadd.f32 %v771_v9, %v465_v37  ;;  %v700_v15 = vpop.f32.mrb[13].mxu1  ;;  %v773_v18 = vpop.f32.mrb[29].mxu0  ;;  %v669_v9 = vadd.f32 %v3135_v26, %v457_v36 }
 0x2a7   :  { %v3183_v1 = vadd.f32 %v700_v15, %v461_v44  ;;  %v3185_v21 = vadd.f32 %v773_v18, %v469_v47  ;;  %v702_v23 = vpop.f32.mrb[14].mxu1  ;;  %v775_v24 = vpop.f32.mrb[30].mxu0  ;;  %v671_v15 = vadd.f32 %v670_v38, %v461_v44 }
 0x2a8   :  { %3629 = vst [vmem:[#allocation31_spill] sm:$0xff] %v3179_v4  ;;  %3630 = vst [vmem:[#allocation32_spill] sm:$0xff] %v3181_v14  ;;  %v3187_v22 = vadd.f32 %v702_v23, %v457_v36  ;;  %v3189_v25 = vadd.f32 %v775_v24, %v465_v37  ;;  %v704_v40 = vpop.f32.mrb[15].mxu1  ;;  %v777_v61 = vpop.f32.mrb[31].mxu0  ;;  %v742_v14 = vadd.f32 %v3137_v27, %v465_v37 }
 0x2a9   :  { %3631 = vst [vmem:[#allocation33_spill] sm:$0xff] %v3183_v1  ;;  %3632 = vst [vmem:[#allocation34_spill] sm:$0xff] %v3185_v21  ;;  %v3191_v48 = vadd.f32 %v704_v40, %v461_v44  ;;  %v3193_v62 = vadd.f32 %v777_v61, %v469_v47  ;;  %v744_v1 = vadd.f32 %v743_v39, %v469_v47 }
 0x2aa   :  { %3633 = vst [vmem:[#allocation35_spill] sm:$0xff] %v3187_v22  ;;  %3634 = vst [vmem:[#allocation36_spill] sm:$0xff] %v3189_v25 }
 0x2ab   :  { %3635 = vst [vmem:[#allocation37_spill] sm:$0xff] %v3191_v48  ;;  %3636 = vst [vmem:[#allocation38_spill] sm:$0xff] %v3193_v62 }
 0x2ad   :  { %v1051_v18 = vpop.f32.mrb[16].mxu1  ;;  %v1092_v21 = vpop.f32.mrb[32].mxu0 }
 0x2ae   :  { %v1099_v4 = vadd.f32 %v1051_v18, %v669_v9  ;;  %v1101_v17 = vadd.f32 %v1092_v21, %v742_v14  ;;  %v1053_v23 = vpop.f32.mrb[17].mxu1  ;;  %v1094_v22 = vpop.f32.mrb[33].mxu0 }
 0x2af   :  { %v1100_v24 = vadd.f32 %v1053_v23, %v671_v15  ;;  %v1102_v25 = vadd.f32 %v1094_v22, %v744_v1  ;;  %v1055_v16 = vpop.f32.mrb[18].mxu1  ;;  %v1096_v13 = vpop.f32.mrb[34].mxu0 }
 0x2b0   :  { %v1103_v40 = vmul.f32 0.5, %v1099_v4  ;;  %v1056_v48 = vpop.f32.mrb[19].mxu1  ;;  %v1097_v61 = vpop.f32.mrb[35].mxu0 }
 0x2b1   :  { %v1107_v62 = vmul.f32 0.5, %v1100_v24  ;;  %v1112_v26 = vmul.f32 0.5, %v1102_v25  ;;  %v3637_v25 = vmov 0  }
 0x2b2   :  { %2516 = vtanh.f32 %v1103_v40 }
 0x2b3   :  { %2518 = vtanh.f32 %v1107_v62 }
 0x2b4   :  { %2520 = vtanh.f32 %v1101_v17 }
 0x2b5   :  { %2522 = vtanh.f32 %v1112_v26 }
 0x2bc   :  { %v2517_v27 = vpop.eup %2516 }
 0x2bd   :  { %v2519_v36 = vpop.eup %2518  ;;  %v1105_v37 = vmul.f32 0.5, %v2517_v27 }
 0x2be   :  { %v1109_v38 = vmul.f32 0.5, %v2519_v36  ;;  %v2521_v44 = vpop.eup %2520 }
 0x2bf   :  { %v1106_v39 = vadd.f32 0.5, %v1105_v37  ;;  %v2523_v13 = vpop.eup %2522 }
 0x2c0   :  { %v1110_v47 = vadd.f32 0.5, %v1109_v38  ;;  %v1114_v22 = vmul.f32 0.5, %v2523_v13 }
 0x2c1   :  { %v1117_v14 = vmul.f32 %v2521_v44, %v1106_v39 }
 0x2c2   :  { %v1116_v1 = vmul.f32 0.0, %v1110_v47  ;;  %v1115_v48 = vadd.f32 0.5, %v1114_v22 }
 0x2c4   :  { %v3197_v16 = vadd.f32 %v1117_v14, %v1116_v1 }
 0x2c6   :  { %2524 = vtanh.f32 %v3197_v16 }
 0x2d0   :  { %v2525_v4 = vpop.eup %2524 }
 0x2d1   :  { %v3200_v17 = vmul.f32 %v2525_v4, %v1115_v48 }
 0x2d3   :  { %v1128_v21 = vpack.c.bf16 %v3200_v17, %v3200_v17 }
 0x2d5   :  { %1162 = vmatmul.mubr.bf16.vlgmr.msra.gmra.mrb[20].mxu1 %v1128_v21  ;;  %1203 = vmatmul.mubr.bf16.vlgmr.msra.gmra.mrb[36].mxu0 %v1128_v21  ;;  %v816_v21 = vpop.permute.xlu1 %815 }
 0x2d6   :  { %1242 = vmatpush1.bf16.msra.mxu1 %v2995_v28  ;;  %1283 = vmatpush1.bf16.msra.mxu0 %v2997_v29 }
 0x2d7   :  { %1243 = vmatprep.subr.bf16.mxu1 %v2999_v30  ;;  %1284 = vmatprep.subr.bf16.mxu0 %v3001_v31 }
 0x2d8   :  { %1273 = vmatprep.mubr.bf16.mxu1 %v3637_v25  ;;  %1314 = vmatprep.mubr.bf16.mxu0 %v3637_v25 }
 0x2da   :  { %1244 = vmatpush1.bf16.msra.mxu1 %v3007_v32  ;;  %1285 = vmatpush1.bf16.msra.mxu0 %v3009_v33 }
 0x2db   :  { %1245 = vmatprep.subr.bf16.mxu1 %v3013_v34  ;;  %1286 = vmatprep.subr.bf16.mxu0 %v3015_v35 }
 0x2de   :  { %1246 = vmatpush1.bf16.msra.mxu1 %v3019_v42  ;;  %1287 = vmatpush1.bf16.msra.mxu0 %v3021_v43 }
 0x2df   :  { %1247 = vmatprep.subr.bf16.mxu1 %v3025_v45  ;;  %1288 = vmatprep.subr.bf16.mxu0 %v3027_v46 }
 0x2e2   :  { %1248 = vmatpush1.bf16.msra.mxu1 %v3031_v49  ;;  %1289 = vmatpush1.bf16.msra.mxu0 %v3033_v50 }
 0x2e3   :  { %1249 = vmatprep.subr.bf16.mxu1 %v3037_v51  ;;  %1290 = vmatprep.subr.bf16.mxu0 %v3039_v52 }
 0x2e6   :  { %1250 = vmatpush1.bf16.msra.mxu1 %v3045_v53  ;;  %1291 = vmatpush1.bf16.msra.mxu0 %v3047_v54 }
 0x2e7   :  { %1251 = vmatprep.subr.bf16.mxu1 %v3051_v55  ;;  %1292 = vmatprep.subr.bf16.mxu0 %v3053_v56 }
 0x2ea   :  { %1252 = vmatpush1.bf16.msra.mxu1 %v3057_v59  ;;  %1293 = vmatpush1.bf16.msra.mxu0 %v3059_v60 }
 0x2eb   :  { %1253 = vmatprep.subr.bf16.mxu1 %v3063_v63  ;;  %1294 = vmatprep.subr.bf16.mxu0 %v3065_v0 }
 0x2ee   :  { %1254 = vmatpush1.bf16.msra.mxu1 %v3070_v5  ;;  %1295 = vmatpush1.bf16.msra.mxu0 %v3073_v6 }
 0x2ef   :  { %1255 = vmatprep.subr.bf16.mxu1 %v3075_v7  ;;  %1296 = vmatprep.subr.bf16.mxu0 %v3077_v8 }
 0x2f2   :  { %1256 = vmatpush1.bf16.msra.mxu1 %v3083_v11  ;;  %1297 = vmatpush1.bf16.msra.mxu0 %v3085_v12 }
 0x2f3   :  { %1353 = vmatprep.subr.bf16.mxu1 %v2989_v19  ;;  %1394 = vmatprep.subr.bf16.mxu0 %v2991_v20 }
 0x3a8   :  { %v1163_v62 = vpop.f32.mrb[20].mxu1  ;;  %v1204_v9 = vpop.f32.mrb[36].mxu0 }
 0x3a9   :  { %v1211_v15 = vadd.f32 %v1163_v62, %v3139_v57  ;;  %v1213_v18 = vadd.f32 %v1204_v9, %v3141_v58  ;;  %v1165_v23 = vpop.f32.mrb[21].mxu1  ;;  %v1206_v24 = vpop.f32.mrb[37].mxu0 }
 0x3aa   :  { %v1212_v40 = vadd.f32 %v1165_v23, %v3143_v2  ;;  %v1214_v61 = vadd.f32 %v1206_v24, %v3145_v3  ;;  %v1167_v26 = vpop.f32.mrb[22].mxu1  ;;  %v1208_v27 = vpop.f32.mrb[38].mxu0 }
 0x3ab   :  { %v1215_v36 = vmul.f32 0.5, %v1211_v15  ;;  %v1168_v37 = vpop.f32.mrb[23].mxu1  ;;  %v1209_v38 = vpop.f32.mrb[39].mxu0  ;;  %v3638_v27 = vld [vmem:[#allocation16_spill] sm:$0xff] }
 0x3ac   :  { %v1219_v39 = vmul.f32 0.5, %v1212_v40  ;;  %v1224_v44 = vmul.f32 0.5, %v1214_v61  ;;  %v819_v9 = vpop.permute.xlu0 %818 }
 0x3ad   :  { %2526 = vtanh.f32 %v1215_v36  ;;  %v3247_v15 = vsel %vm812_vm8, %v816_v21, %v819_v9 }
 0x3ae   :  { %2528 = vtanh.f32 %v1219_v39  ;;  %vm1121_vm9 = vcmp.eq.s32.totalorder %v3247_v15, 0  ;;  %vm1233_vm10 = vcmp.eq.s32.totalorder %v3247_v15, 1  ;;  %v3639_v39 = vld [vmem:[#allocation17_spill] sm:$0xff]  ;;  %vm1345_vm11 = vcmp.eq.s32.totalorder %v3247_v15, 2 }
 0x3af   :  { %2530 = vtanh.f32 %v1213_v18  ;;  %v1122_v40 = vsel %vm1121_vm9, %v3200_v17, 0.0  ;;  %vm1457_vm12 = vcmp.eq.s32.totalorder %v3247_v15, 3  ;;  %vm1569_vm13 = vcmp.eq.s32.totalorder %v3247_v15, 4 }
 0x3b0   :  { %2532 = vtanh.f32 %v1224_v44  ;;  %vm1681_vm14 = vcmp.eq.s32.totalorder %v3247_v15, 5  ;;  %vm1793_vm15 = vcmp.eq.s32.totalorder %v3247_v15, 6  ;;  %vm1905_vm2 = vcmp.eq.s32.totalorder %v3247_v15, 7  ;;  %v2246_v15 = vld [vmem:[%s3602_s7] ss:$0 sm:$0xff]  ;;  %s2718_s7 = scalar_lea.vmem %s2140_s15, 128 }
 0x3b1   :  { %p2719_p4 = scmp.ne.s32.totalorder %s2140_s15, %s2718_s7  ;;  %p2724_p6 = scmp.lt.s32.totalorder %s2718_s7, %s2718_s7 }
 0x3b3   :  { %p2725_p7 = por %p2724_p6, %p2723_p5 }
 0x3b5   :  { %p2726_p8 = pnand %p2725_p7, %p2719_p4 }
 0x3b7   :  { %v2527_v47 = vpop.eup %2526 }
 0x3b8   :  { %v2529_v57 = vpop.eup %2528  ;;  %v1217_v14 = vmul.f32 0.5, %v2527_v47  ;;  %v3640_v47 = vld [vmem:[#allocation18_spill] sm:$0xff] }
 0x3b9   :  { %v1221_v58 = vmul.f32 0.5, %v2529_v57  ;;  %v2531_v13 = vpop.eup %2530 }
 0x3ba   :  { %v1218_v1 = vadd.f32 0.5, %v1217_v14  ;;  %v2533_v4 = vpop.eup %2532 }
 0x3bb   :  { %v1222_v2 = vadd.f32 0.5, %v1221_v58  ;;  %v1226_v62 = vmul.f32 0.5, %v2533_v4 }
 0x3bc   :  { %v1229_v22 = vmul.f32 %v2531_v13, %v1218_v1 }
 0x3bd   :  { %v1228_v3 = vmul.f32 %v1222_v2, %v3197_v16  ;;  %v1227_v18 = vadd.f32 0.5, %v1226_v62 }
 0x3bf   :  { %v3243_v48 = vadd.f32 %v1229_v22, %v1228_v3 }
 0x3c1   :  { %2534 = vtanh.f32 %v3243_v48 }
 0x3cb   :  { %v2535_v23 = vpop.eup %2534 }
 0x3cc   :  { %v1232_v24 = vmul.f32 %v2535_v23, %v1227_v18 }
 0x3ce   :  { %v3252_v16 = vsel %vm1233_vm10, %v1232_v24, %v1122_v40  ;;  %v1240_v61 = vpack.c.bf16 %v1232_v24, %v1232_v24 }
 0x3d0   :  { %1274 = vmatmul.mubr.bf16.vlgmr.msra.gmra.mrb[24].mxu1 %v1240_v61  ;;  %1315 = vmatmul.mubr.bf16.vlgmr.msra.gmra.mrb[40].mxu0 %v1240_v61 }
 0x3d1   :  { %1354 = vmatpush1.bf16.msra.mxu1 %v2995_v28  ;;  %1395 = vmatpush1.bf16.msra.mxu0 %v2997_v29 }
 0x3d2   :  { %1355 = vmatprep.subr.bf16.mxu1 %v2999_v30  ;;  %1396 = vmatprep.subr.bf16.mxu0 %v3001_v31 }
 0x3d3   :  { %1385 = vmatprep.mubr.bf16.mxu1 %v3637_v25  ;;  %1426 = vmatprep.mubr.bf16.mxu0 %v3637_v25 }
 0x3d5   :  { %1356 = vmatpush1.bf16.msra.mxu1 %v3007_v32  ;;  %1397 = vmatpush1.bf16.msra.mxu0 %v3009_v33 }
 0x3d6   :  { %1357 = vmatprep.subr.bf16.mxu1 %v3013_v34  ;;  %1398 = vmatprep.subr.bf16.mxu0 %v3015_v35 }
 0x3d9   :  { %1358 = vmatpush1.bf16.msra.mxu1 %v3019_v42  ;;  %1399 = vmatpush1.bf16.msra.mxu0 %v3021_v43 }
 0x3da   :  { %1359 = vmatprep.subr.bf16.mxu1 %v3025_v45  ;;  %1400 = vmatprep.subr.bf16.mxu0 %v3027_v46 }
 0x3dd   :  { %1360 = vmatpush1.bf16.msra.mxu1 %v3031_v49  ;;  %1401 = vmatpush1.bf16.msra.mxu0 %v3033_v50 }
 0x3de   :  { %1361 = vmatprep.subr.bf16.mxu1 %v3037_v51  ;;  %1402 = vmatprep.subr.bf16.mxu0 %v3039_v52 }
 0x3e1   :  { %1362 = vmatpush1.bf16.msra.mxu1 %v3045_v53  ;;  %1403 = vmatpush1.bf16.msra.mxu0 %v3047_v54 }
 0x3e2   :  { %1363 = vmatprep.subr.bf16.mxu1 %v3051_v55  ;;  %1404 = vmatprep.subr.bf16.mxu0 %v3053_v56 }
 0x3e5   :  { %1364 = vmatpush1.bf16.msra.mxu1 %v3057_v59  ;;  %1405 = vmatpush1.bf16.msra.mxu0 %v3059_v60 }
 0x3e6   :  { %1365 = vmatprep.subr.bf16.mxu1 %v3063_v63  ;;  %1406 = vmatprep.subr.bf16.mxu0 %v3065_v0 }
 0x3e9   :  { %1366 = vmatpush1.bf16.msra.mxu1 %v3070_v5  ;;  %1407 = vmatpush1.bf16.msra.mxu0 %v3073_v6 }
 0x3ea   :  { %1367 = vmatprep.subr.bf16.mxu1 %v3075_v7  ;;  %1408 = vmatprep.subr.bf16.mxu0 %v3077_v8 }
 0x3ed   :  { %1368 = vmatpush1.bf16.msra.mxu1 %v3083_v11  ;;  %1409 = vmatpush1.bf16.msra.mxu0 %v3085_v12 }
 0x3ee   :  { %1465 = vmatprep.subr.bf16.mxu1 %v2989_v19  ;;  %1506 = vmatprep.subr.bf16.mxu0 %v2991_v20 }
 0x4a3   :  { %v1275_v41 = vpop.f32.mrb[24].mxu1  ;;  %v1316_v17 = vpop.f32.mrb[40].mxu0 }
 0x4a4   :  { %v1323_v26 = vadd.f32 %v1275_v41, %v3147_v10  ;;  %v1325_v36 = vadd.f32 %v1316_v17, %v3638_v27  ;;  %v1277_v37 = vpop.f32.mrb[25].mxu1  ;;  %v1318_v38 = vpop.f32.mrb[41].mxu0 }
 0x4a5   :  { %v1324_v44 = vadd.f32 %v1277_v37, %v3639_v39  ;;  %v1326_v57 = vadd.f32 %v1318_v38, %v3640_v47  ;;  %v1279_v14 = vpop.f32.mrb[26].mxu1  ;;  %v1320_v58 = vpop.f32.mrb[42].mxu0  ;;  %v3641_v39 = vld [vmem:[#allocation19_spill] sm:$0xff]  ;;  %v3642_v47 = vld [vmem:[#allocation20_spill] sm:$0xff] }
 0x4a6   :  { %v1327_v1 = vmul.f32 0.5, %v1323_v26  ;;  %v1280_v13 = vpop.f32.mrb[27].mxu1  ;;  %v1321_v2 = vpop.f32.mrb[43].mxu0 }
 0x4a7   :  { %v1331_v22 = vmul.f32 0.5, %v1324_v44  ;;  %v1336_v3 = vmul.f32 0.5, %v1326_v57  ;;  %v3644_v2 = vld [vmem:[#allocation22_spill] sm:$0xff] }
 0x4a8   :  { %2536 = vtanh.f32 %v1327_v1  ;;  %v3643_v1 = vld [vmem:[#allocation21_spill] sm:$0xff] }
 0x4a9   :  { %2538 = vtanh.f32 %v1331_v22 }
 0x4aa   :  { %2540 = vtanh.f32 %v1325_v36 }
 0x4ab   :  { %2542 = vtanh.f32 %v1336_v3 }
 0x4b2   :  { %v2537_v4 = vpop.eup %2536 }
 0x4b3   :  { %v2539_v10 = vpop.eup %2538  ;;  %v1329_v21 = vmul.f32 0.5, %v2537_v4 }
 0x4b4   :  { %v1333_v62 = vmul.f32 0.5, %v2539_v10  ;;  %v2541_v18 = vpop.eup %2540 }
 0x4b5   :  { %v1330_v9 = vadd.f32 0.5, %v1329_v21  ;;  %v2543_v41 = vpop.eup %2542 }
 0x4b6   :  { %v1334_v23 = vadd.f32 0.5, %v1333_v62  ;;  %v1338_v17 = vmul.f32 0.5, %v2543_v41 }
 0x4b7   :  { %v1341_v24 = vmul.f32 %v2541_v18, %v1330_v9 }
 0x4b8   :  { %v1340_v40 = vmul.f32 %v1334_v23, %v3243_v48  ;;  %v1339_v26 = vadd.f32 0.5, %v1338_v17 }
 0x4ba   :  { %v3293_v61 = vadd.f32 %v1341_v24, %v1340_v40 }
 0x4bc   :  { %2544 = vtanh.f32 %v3293_v61 }
 0x4c6   :  { %v2545_v27 = vpop.eup %2544 }
 0x4c7   :  { %v1344_v36 = vmul.f32 %v2545_v27, %v1339_v26 }
 0x4c9   :  { %v3298_v37 = vsel %vm1345_vm11, %v1344_v36, %v3252_v16  ;;  %v1352_v38 = vpack.c.bf16 %v1344_v36, %v1344_v36 }
 0x4cb   :  { %1386 = vmatmul.mubr.bf16.vlgmr.msra.gmra.mrb[28].mxu1 %v1352_v38  ;;  %1427 = vmatmul.mubr.bf16.vlgmr.msra.gmra.mrb[44].mxu0 %v1352_v38 }
 0x4cc   :  { %1466 = vmatpush1.bf16.msra.mxu1 %v2995_v28  ;;  %1507 = vmatpush1.bf16.msra.mxu0 %v2997_v29 }
 0x4cd   :  { %1467 = vmatprep.subr.bf16.mxu1 %v2999_v30  ;;  %1508 = vmatprep.subr.bf16.mxu0 %v3001_v31 }
 0x4ce   :  { %1497 = vmatprep.mubr.bf16.mxu1 %v3637_v25  ;;  %1538 = vmatprep.mubr.bf16.mxu0 %v3637_v25 }
 0x4d0   :  { %1468 = vmatpush1.bf16.msra.mxu1 %v3007_v32  ;;  %1509 = vmatpush1.bf16.msra.mxu0 %v3009_v33 }
 0x4d1   :  { %1469 = vmatprep.subr.bf16.mxu1 %v3013_v34  ;;  %1510 = vmatprep.subr.bf16.mxu0 %v3015_v35 }
 0x4d4   :  { %1470 = vmatpush1.bf16.msra.mxu1 %v3019_v42  ;;  %1511 = vmatpush1.bf16.msra.mxu0 %v3021_v43 }
 0x4d5   :  { %1471 = vmatprep.subr.bf16.mxu1 %v3025_v45  ;;  %1512 = vmatprep.subr.bf16.mxu0 %v3027_v46 }
 0x4d8   :  { %1472 = vmatpush1.bf16.msra.mxu1 %v3031_v49  ;;  %1513 = vmatpush1.bf16.msra.mxu0 %v3033_v50 }
 0x4d9   :  { %1473 = vmatprep.subr.bf16.mxu1 %v3037_v51  ;;  %1514 = vmatprep.subr.bf16.mxu0 %v3039_v52 }
 0x4dc   :  { %1474 = vmatpush1.bf16.msra.mxu1 %v3045_v53  ;;  %1515 = vmatpush1.bf16.msra.mxu0 %v3047_v54 }
 0x4dd   :  { %1475 = vmatprep.subr.bf16.mxu1 %v3051_v55  ;;  %1516 = vmatprep.subr.bf16.mxu0 %v3053_v56 }
 0x4e0   :  { %1476 = vmatpush1.bf16.msra.mxu1 %v3057_v59  ;;  %1517 = vmatpush1.bf16.msra.mxu0 %v3059_v60 }
 0x4e1   :  { %1477 = vmatprep.subr.bf16.mxu1 %v3063_v63  ;;  %1518 = vmatprep.subr.bf16.mxu0 %v3065_v0 }
 0x4e4   :  { %1478 = vmatpush1.bf16.msra.mxu1 %v3070_v5  ;;  %1519 = vmatpush1.bf16.msra.mxu0 %v3073_v6 }
 0x4e5   :  { %1479 = vmatprep.subr.bf16.mxu1 %v3075_v7  ;;  %1520 = vmatprep.subr.bf16.mxu0 %v3077_v8 }
 0x4e8   :  { %1480 = vmatpush1.bf16.msra.mxu1 %v3083_v11  ;;  %1521 = vmatpush1.bf16.msra.mxu0 %v3085_v12 }
 0x4e9   :  { %1577 = vmatprep.subr.bf16.mxu1 %v2989_v19  ;;  %1618 = vmatprep.subr.bf16.mxu0 %v2991_v20 }
 0x59e   :  { %v1387_v48 = vpop.f32.mrb[28].mxu1  ;;  %v1428_v16 = vpop.f32.mrb[44].mxu0 }
 0x59f   :  { %v1435_v44 = vadd.f32 %v1387_v48, %v3641_v39  ;;  %v1437_v57 = vadd.f32 %v1428_v16, %v3642_v47  ;;  %v1389_v14 = vpop.f32.mrb[29].mxu1  ;;  %v1430_v58 = vpop.f32.mrb[45].mxu0 }
 0x5a0   :  { %v1436_v13 = vadd.f32 %v1389_v14, %v3643_v1  ;;  %v1438_v22 = vadd.f32 %v1430_v58, %v3644_v2  ;;  %v1391_v3 = vpop.f32.mrb[30].mxu1  ;;  %v1432_v4 = vpop.f32.mrb[46].mxu0 }
 0x5a1   :  { %v1439_v10 = vmul.f32 0.5, %v1435_v44  ;;  %v1392_v21 = vpop.f32.mrb[31].mxu1  ;;  %v1433_v62 = vpop.f32.mrb[47].mxu0 }
 0x5a2   :  { %v1443_v19 = vmul.f32 0.5, %v1436_v13  ;;  %v1448_v20 = vmul.f32 0.5, %v1438_v22 }
 0x5a3   :  { %2546 = vtanh.f32 %v1439_v10 }
 0x5a4   :  { %2548 = vtanh.f32 %v1443_v19 }
 0x5a5   :  { %2550 = vtanh.f32 %v1437_v57 }
 0x5a6   :  { %2552 = vtanh.f32 %v1448_v20  ;;  %v3396_v20 = vld [vmem:[#allocation8] ss:$16 sps:$4 sm:$0xff]  }
 0x5ad   :  { %v2547_v9 = vpop.eup %2546 }
 0x5ae   :  { %v2549_v18 = vpop.eup %2548  ;;  %v1441_v23 = vmul.f32 0.5, %v2547_v9  ;;  %v3399_v9 = vld [vmem:[#allocation8 + $0x8] ss:$16 sps:$4 sm:$0xff]  }
 0x5af   :  { %v1445_v24 = vmul.f32 0.5, %v2549_v18  ;;  %v2551_v41 = vpop.eup %2550  ;;  %v3402_v18 = vld [vmem:[#allocation8 + $0x24] ss:$16 sps:$4 sm:$0xff]  }
 0x5b0   :  { %v1442_v40 = vadd.f32 0.5, %v1441_v23  ;;  %v2553_v38 = vpop.eup %2552  ;;  %v3405_v23 = vld [vmem:[#allocation8 + $0x2c] ss:$16 sps:$4 sm:$0xff]  }
 0x5b1   :  { %v1446_v17 = vadd.f32 0.5, %v1445_v24  ;;  %v1450_v48 = vmul.f32 0.5, %v2553_v38  ;;  %v3410_v24 = vld [vmem:[#allocation8 + $0x20] ss:$16 sps:$4 sm:$0xff]   ;;  %v3431_v38 = vld [vmem:[#allocation8 + $0x6c] ss:$16 sps:$4 sm:$0xff]  }
 0x5b2   :  { %v1453_v26 = vmul.f32 %v2551_v41, %v1442_v40  ;;  %v3413_v40 = vld [vmem:[#allocation8 + $0x28] ss:$16 sps:$4 sm:$0xff]   ;;  %v3416_v41 = vld [vmem:[#allocation8 + $0x44] ss:$16 sps:$4 sm:$0xff]  }
 0x5b3   :  { %v1452_v27 = vmul.f32 %v1446_v17, %v3293_v61  ;;  %v1451_v16 = vadd.f32 0.5, %v1450_v48  ;;  %v3419_v17 = vld [vmem:[#allocation8 + $0x4c] ss:$16 sps:$4 sm:$0xff]   ;;  %v3434_v48 = vld [vmem:[#allocation8 + $0x60] ss:$16 sps:$4 sm:$0xff]  }
 0x5b5   :  { %v3339_v36 = vadd.f32 %v1453_v26, %v1452_v27  ;;  %v3422_v26 = vld [vmem:[#allocation8 + $0x40] ss:$16 sps:$4 sm:$0xff]   ;;  %v3425_v27 = vld [vmem:[#allocation8 + $0x48] ss:$16 sps:$4 sm:$0xff]  }
 0x5b7   :  { %2554 = vtanh.f32 %v3339_v36 }
 0x5c1   :  { %v2555_v39 = vpop.eup %2554 }
 0x5c2   :  { %v1456_v44 = vmul.f32 %v2555_v39, %v1451_v16  ;;  %v3437_v16 = vld [vmem:[#allocation8 + $0x68] ss:$16 sps:$4 sm:$0xff]   ;;  %v3440_v39 = vld [vmem:[#allocation8 + $0x84] ss:$16 sps:$4 sm:$0xff]  }
 0x5c4   :  { %v3344_v47 = vsel %vm1457_vm12, %v1456_v44, %v3298_v37  ;;  %v1464_v57 = vpack.c.bf16 %v1456_v44, %v1456_v44  ;;  %v3443_v44 = vld [vmem:[#allocation8 + $0x8c] ss:$16 sps:$4 sm:$0xff]  }
 0x5c6   :  { %1498 = vmatmul.mubr.bf16.vlgmr.msra.gmra.mrb[32].mxu1 %v1464_v57  ;;  %1539 = vmatmul.mubr.bf16.vlgmr.msra.gmra.mrb[48].mxu0 %v1464_v57  ;;  %v3449_v57 = vld [vmem:[#allocation8 + $0x88] ss:$16 sps:$4 sm:$0xff]  }
 0x5c7   :  { %1578 = vmatpush1.bf16.msra.mxu1 %v2995_v28  ;;  %1619 = vmatpush1.bf16.msra.mxu0 %v2997_v29  ;;  %v3378_v28 = vld [vmem:[#allocation8 + $0x4] ss:$16 sps:$4 sm:$0xff]   ;;  %v3381_v29 = vld [vmem:[#allocation8 + $0xc] ss:$16 sps:$4 sm:$0xff]  }
 0x5c8   :  { %1579 = vmatprep.subr.bf16.mxu1 %v2999_v30  ;;  %1620 = vmatprep.subr.bf16.mxu0 %v3001_v31 }
 0x5c9   :  { %1609 = vmatprep.mubr.bf16.mxu1 %v3637_v25  ;;  %1650 = vmatprep.mubr.bf16.mxu0 %v3637_v25 }
 0x5cb   :  { %1580 = vmatpush1.bf16.msra.mxu1 %v3007_v32  ;;  %1621 = vmatpush1.bf16.msra.mxu0 %v3009_v33  ;;  %v3645_v32 = vld [vmem:[#allocation23_spill] sm:$0xff] }
 0x5cc   :  { %1581 = vmatprep.subr.bf16.mxu1 %v3013_v34  ;;  %1622 = vmatprep.subr.bf16.mxu0 %v3015_v35  ;;  %v3646_v34 = vld [vmem:[#allocation24_spill] sm:$0xff] }
 0x5cf   :  { %1582 = vmatpush1.bf16.msra.mxu1 %v3019_v42  ;;  %1623 = vmatpush1.bf16.msra.mxu0 %v3021_v43 }
 0x5d0   :  { %1583 = vmatprep.subr.bf16.mxu1 %v3025_v45  ;;  %1624 = vmatprep.subr.bf16.mxu0 %v3027_v46  ;;  %v3647_v45 = vld [vmem:[#allocation25_spill] sm:$0xff] }
 0x5d3   :  { %1584 = vmatpush1.bf16.msra.mxu1 %v3031_v49  ;;  %1625 = vmatpush1.bf16.msra.mxu0 %v3033_v50  ;;  %v3648_v49 = vld [vmem:[#allocation26_spill] sm:$0xff] }
 0x5d4   :  { %1585 = vmatprep.subr.bf16.mxu1 %v3037_v51  ;;  %1626 = vmatprep.subr.bf16.mxu0 %v3039_v52 }
 0x5d7   :  { %1586 = vmatpush1.bf16.msra.mxu1 %v3045_v53  ;;  %1627 = vmatpush1.bf16.msra.mxu0 %v3047_v54 }
 0x5d8   :  { %1587 = vmatprep.subr.bf16.mxu1 %v3051_v55  ;;  %1628 = vmatprep.subr.bf16.mxu0 %v3053_v56 }
 0x5db   :  { %1588 = vmatpush1.bf16.msra.mxu1 %v3057_v59  ;;  %1629 = vmatpush1.bf16.msra.mxu0 %v3059_v60 }
 0x5dc   :  { %1589 = vmatprep.subr.bf16.mxu1 %v3063_v63  ;;  %1630 = vmatprep.subr.bf16.mxu0 %v3065_v0 }
 0x5df   :  { %1590 = vmatpush1.bf16.msra.mxu1 %v3070_v5  ;;  %1631 = vmatpush1.bf16.msra.mxu0 %v3073_v6 }
 0x5e0   :  { %1591 = vmatprep.subr.bf16.mxu1 %v3075_v7  ;;  %1632 = vmatprep.subr.bf16.mxu0 %v3077_v8 }
 0x5e3   :  { %1592 = vmatpush1.bf16.msra.mxu1 %v3083_v11  ;;  %1633 = vmatpush1.bf16.msra.mxu0 %v3085_v12 }
 0x5e4   :  { %1689 = vmatprep.subr.bf16.mxu1 %v3378_v28  ;;  %1730 = vmatprep.subr.bf16.mxu0 %v3381_v29 }
 0x699   :  { %v1499_v30 = vpop.f32.mrb[32].mxu1  ;;  %v1540_v31 = vpop.f32.mrb[48].mxu0 }
 0x69a   :  { %v1547_v33 = vadd.f32 %v1499_v30, %v3645_v32  ;;  %v1549_v35 = vadd.f32 %v1540_v31, %v3646_v34  ;;  %v1501_v42 = vpop.f32.mrb[33].mxu1  ;;  %v1542_v43 = vpop.f32.mrb[49].mxu0  ;;  %v3452_v30 = vld [vmem:[#allocation8 + $0xa4] ss:$16 sps:$4 sm:$0xff]   ;;  %v3455_v31 = vld [vmem:[#allocation8 + $0xac] ss:$16 sps:$4 sm:$0xff]  }
 0x69b   :  { %v1548_v46 = vadd.f32 %v1501_v42, %v3647_v45  ;;  %v1550_v50 = vadd.f32 %v1542_v43, %v3648_v49  ;;  %v1503_v51 = vpop.f32.mrb[34].mxu1  ;;  %v1544_v52 = vpop.f32.mrb[50].mxu0  ;;  %v3458_v32 = vld [vmem:[#allocation8 + $0xa0] ss:$16 sps:$4 sm:$0xff]   ;;  %v3464_v34 = vld [vmem:[#allocation8 + $0xc4] ss:$16 sps:$4 sm:$0xff]  }
 0x69c   :  { %v1551_v53 = vmul.f32 0.5, %v1547_v33  ;;  %v1504_v54 = vpop.f32.mrb[35].mxu1  ;;  %v1545_v55 = vpop.f32.mrb[51].mxu0  ;;  %v3461_v33 = vld [vmem:[#allocation8 + $0xa8] ss:$16 sps:$4 sm:$0xff]   ;;  %v3649_v45 = vld [vmem:[#allocation27_spill] sm:$0xff] }
 0x69d   :  { %v1555_v56 = vmul.f32 0.5, %v1548_v46  ;;  %v1560_v59 = vmul.f32 0.5, %v1550_v50  ;;  %v3650_v49 = vld [vmem:[#allocation28_spill] sm:$0xff]  ;;  %v3651_v51 = vld [vmem:[#allocation29_spill] sm:$0xff]  ;;  %v3652_v52 = vld [vmem:[#allocation30_spill] sm:$0xff] }
 0x69e   :  { %2556 = vtanh.f32 %v1551_v53 }
 0x69f   :  { %2558 = vtanh.f32 %v1555_v56 }
 0x6a0   :  { %2560 = vtanh.f32 %v1549_v35  ;;  %v3467_v35 = vld [vmem:[#allocation8 + $0xcc] ss:$16 sps:$4 sm:$0xff]  }
 0x6a1   :  { %2562 = vtanh.f32 %v1560_v59 }
 0x6a8   :  { %v2557_v60 = vpop.eup %2556 }
 0x6a9   :  { %v2559_v63 = vpop.eup %2558  ;;  %v1553_v0 = vmul.f32 0.5, %v2557_v60 }
 0x6aa   :  { %v1557_v61 = vmul.f32 0.5, %v2559_v63  ;;  %v2561_v14 = vpop.eup %2560 }
 0x6ab   :  { %v1554_v37 = vadd.f32 0.5, %v1553_v0  ;;  %v2563_v22 = vpop.eup %2562 }
 0x6ac   :  { %v1558_v58 = vadd.f32 0.5, %v1557_v61  ;;  %v1562_v3 = vmul.f32 0.5, %v2563_v22 }
 0x6ad   :  { %v1565_v1 = vmul.f32 %v2561_v14, %v1554_v37 }
 0x6ae   :  { %v1564_v13 = vmul.f32 %v1558_v58, %v3339_v36  ;;  %v1563_v4 = vadd.f32 0.5, %v1562_v3  ;;  %v3428_v36 = vld [vmem:[#allocation8 + $0x64] ss:$16 sps:$4 sm:$0xff]  }
 0x6b0   :  { %v3389_v2 = vadd.f32 %v1565_v1, %v1564_v13 }
 0x6b2   :  { %2564 = vtanh.f32 %v3389_v2 }
 0x6bc   :  { %v2565_v10 = vpop.eup %2564 }
 0x6bd   :  { %v1568_v21 = vmul.f32 %v2565_v10, %v1563_v4 }
 0x6bf   :  { %v3394_v62 = vsel %vm1569_vm13, %v1568_v21, %v3344_v47  ;;  %v1576_v19 = vpack.c.bf16 %v1568_v21, %v1568_v21  ;;  %v3446_v47 = vld [vmem:[#allocation8 + $0x80] ss:$16 sps:$4 sm:$0xff]  }
 0x6c1   :  { %1610 = vmatmul.mubr.bf16.vlgmr.msra.gmra.mrb[36].mxu1 %v1576_v19  ;;  %1651 = vmatmul.mubr.bf16.vlgmr.msra.gmra.mrb[52].mxu0 %v1576_v19 }
 0x6c2   :  { %1690 = vmatpush1.bf16.msra.mxu1 %v3396_v20  ;;  %1731 = vmatpush1.bf16.msra.mxu0 %v3399_v9 }
 0x6c3   :  { %1691 = vmatprep.subr.bf16.mxu1 %v3402_v18  ;;  %1732 = vmatprep.subr.bf16.mxu0 %v3405_v23 }
 0x6c4   :  { %1721 = vmatprep.mubr.bf16.mxu1 %v3637_v25  ;;  %1762 = vmatprep.mubr.bf16.mxu0 %v3637_v25 }
 0x6c6   :  { %1692 = vmatpush1.bf16.msra.mxu1 %v3410_v24  ;;  %1733 = vmatpush1.bf16.msra.mxu0 %v3413_v40 }
 0x6c7   :  { %1693 = vmatprep.subr.bf16.mxu1 %v3416_v41  ;;  %1734 = vmatprep.subr.bf16.mxu0 %v3419_v17 }
 0x6ca   :  { %1694 = vmatpush1.bf16.msra.mxu1 %v3422_v26  ;;  %1735 = vmatpush1.bf16.msra.mxu0 %v3425_v27 }
 0x6cb   :  { %1695 = vmatprep.subr.bf16.mxu1 %v3428_v36  ;;  %1736 = vmatprep.subr.bf16.mxu0 %v3431_v38 }
 0x6ce   :  { %1696 = vmatpush1.bf16.msra.mxu1 %v3434_v48  ;;  %1737 = vmatpush1.bf16.msra.mxu0 %v3437_v16 }
 0x6cf   :  { %1697 = vmatprep.subr.bf16.mxu1 %v3440_v39  ;;  %1738 = vmatprep.subr.bf16.mxu0 %v3443_v44 }
 0x6d2   :  { %1698 = vmatpush1.bf16.msra.mxu1 %v3446_v47  ;;  %1739 = vmatpush1.bf16.msra.mxu0 %v3449_v57 }
 0x6d3   :  { %1699 = vmatprep.subr.bf16.mxu1 %v3452_v30  ;;  %1740 = vmatprep.subr.bf16.mxu0 %v3455_v31 }
 0x6d6   :  { %1700 = vmatpush1.bf16.msra.mxu1 %v3458_v32  ;;  %1741 = vmatpush1.bf16.msra.mxu0 %v3461_v33 }
 0x6d7   :  { %1701 = vmatprep.subr.bf16.mxu1 %v3464_v34  ;;  %1742 = vmatprep.subr.bf16.mxu0 %v3467_v35 }
 0x6da   :  { %1702 = vmatpush1.bf16.msra.mxu1 %v3070_v5  ;;  %1743 = vmatpush1.bf16.msra.mxu0 %v3073_v6 }
 0x6db   :  { %1703 = vmatprep.subr.bf16.mxu1 %v3075_v7  ;;  %1744 = vmatprep.subr.bf16.mxu0 %v3077_v8 }
 0x6de   :  { %1704 = vmatpush1.bf16.msra.mxu1 %v3083_v11  ;;  %1745 = vmatpush1.bf16.msra.mxu0 %v3085_v12 }
 0x6df   :  { %1801 = vmatprep.subr.bf16.mxu1 %v3378_v28  ;;  %1842 = vmatprep.subr.bf16.mxu0 %v3381_v29 }
 0x794   :  { %v1611_v42 = vpop.f32.mrb[36].mxu1  ;;  %v1652_v43 = vpop.f32.mrb[52].mxu0 }
 0x795   :  { %v1659_v46 = vadd.f32 %v1611_v42, %v3649_v45  ;;  %v1661_v5 = vadd.f32 %v1652_v43, %v3650_v49  ;;  %v1613_v50 = vpop.f32.mrb[37].mxu1  ;;  %v1654_v6 = vpop.f32.mrb[53].mxu0 }
 0x796   :  { %v1660_v7 = vadd.f32 %v1613_v50, %v3651_v51  ;;  %v1662_v8 = vadd.f32 %v1654_v6, %v3652_v52  ;;  %v1615_v53 = vpop.f32.mrb[38].mxu1  ;;  %v1656_v11 = vpop.f32.mrb[54].mxu0 }
 0x797   :  { %v1663_v54 = vmul.f32 0.5, %v1659_v46  ;;  %v1616_v12 = vpop.f32.mrb[39].mxu1  ;;  %v1657_v55 = vpop.f32.mrb[55].mxu0 }
 0x798   :  { %v1667_v28 = vmul.f32 0.5, %v1660_v7  ;;  %v1672_v29 = vmul.f32 0.5, %v1662_v8  ;;  %v2500_v12 = vld [vmem:[%s3601_s6] sm:$0xff]   ;;  %v2759_v55 = vmov 0.0  }
 0x799   :  { %2566 = vtanh.f32 %v1663_v54 }
 0x79a   :  { %2568 = vtanh.f32 %v1667_v28  ;;  %v2501_v28 = vld [vmem:[%s3601_s6 + $0x8] sm:$0xff]  }
 0x79b   :  { %2570 = vtanh.f32 %v1661_v5 }
 0x79c   :  { %2572 = vtanh.f32 %v1672_v29  ;;  %v2502_v29 = vld [vmem:[%s3601_s6 + $0x10] sm:$0xff]  }
 0x7a3   :  { %v2567_v56 = vpop.eup %2566 }
 0x7a4   :  { %v2569_v59 = vpop.eup %2568  ;;  %v1665_v60 = vmul.f32 0.5, %v2567_v56  ;;  %v2503_v56 = vld [vmem:[%s3601_s6 + $0x18] sm:$0xff]  }
 0x7a5   :  { %v1669_v63 = vmul.f32 0.5, %v2569_v59  ;;  %v2571_v61 = vpop.eup %2570  ;;  %v2504_v59 = vld [vmem:[%s3601_s6 + $0x20] sm:$0xff]  }
 0x7a6   :  { %v1666_v0 = vadd.f32 0.5, %v1665_v60  ;;  %v2573_v13 = vpop.eup %2572  ;;  %v2505_v60 = vld [vmem:[%s3601_s6 + $0x28] sm:$0xff]  }
 0x7a7   :  { %v1670_v37 = vadd.f32 0.5, %v1669_v63  ;;  %v1674_v22 = vmul.f32 0.5, %v2573_v13  ;;  %v2506_v63 = vld [vmem:[%s3601_s6 + $0x30] sm:$0xff]  }
 0x7a8   :  { %v1677_v14 = vmul.f32 %v2571_v61, %v1666_v0  ;;  %v2507_v0 = vld [vmem:[%s3601_s6 + $0x38] sm:$0xff]   ;;  %v2508_v61 = vld [vmem:[#allocation9] sm:$0xff]  }
 0x7a9   :  { %v1676_v58 = vmul.f32 %v1670_v37, %v3389_v2  ;;  %v1675_v3 = vadd.f32 0.5, %v1674_v22  ;;  %v2625_v2 = vld [vmem:[#allocation8 + $0xc8] ss:$16 sps:$4 sm:$0xff]   ;;  %v3657_v22 = vld [vmem:[#allocation35_spill] sm:$0xff] }
 0x7aa   :  { %v2509_v37 = vld [vmem:[#allocation9 + $0x8] sm:$0xff]  }
 0x7ab   :  { %v3483_v1 = vadd.f32 %v1677_v14, %v1676_v58  ;;  %v2510_v14 = vld [vmem:[#allocation9 + $0x10] sm:$0xff]   ;;  %v2511_v58 = vld [vmem:[#allocation9 + $0x18] sm:$0xff]  }
 0x7ad   :  { %2574 = vtanh.f32 %v3483_v1 }
 0x7b7   :  { %v2575_v4 = vpop.eup %2574 }
 0x7b8   :  { %v1680_v10 = vmul.f32 %v2575_v4, %v1675_v3  ;;  %v3658_v4 = vld [vmem:[#allocation36_spill] sm:$0xff] }
 0x7ba   :  { %v3488_v21 = vsel %vm1681_vm14, %v1680_v10, %v3394_v62  ;;  %v1688_v19 = vpack.c.bf16 %v1680_v10, %v1680_v10  ;;  %v2626_v62 = vld [vmem:[#allocation8 + $0xe4] ss:$16 sps:$4 sm:$0xff]  }
 0x7bc   :  { %1722 = vmatmul.mubr.bf16.vlgmr.msra.gmra.mrb[40].mxu1 %v1688_v19  ;;  %1763 = vmatmul.mubr.bf16.vlgmr.msra.gmra.mrb[56].mxu0 %v1688_v19 }
 0x7bd   :  { %1802 = vmatpush1.bf16.msra.mxu1 %v3396_v20  ;;  %1843 = vmatpush1.bf16.msra.mxu0 %v3399_v9  ;;  %v2627_v20 = vld [vmem:[#allocation8 + $0xec] ss:$16 sps:$4 sm:$0xff]   ;;  %v2628_v9 = vld [vmem:[#allocation8 + $0xe0] ss:$16 sps:$4 sm:$0xff]  }
 0x7be   :  { %1803 = vmatprep.subr.bf16.mxu1 %v3402_v18  ;;  %1844 = vmatprep.subr.bf16.mxu0 %v3405_v23  ;;  %v2629_v18 = vld [vmem:[#allocation8 + $0xe8] ss:$16 sps:$4 sm:$0xff]  }
 0x7bf   :  { %1833 = vmatprep.mubr.bf16.mxu1 %v3637_v25  ;;  %1874 = vmatprep.mubr.bf16.mxu0 %v3637_v25  ;;  %v2624_v25 = vld [vmem:[#allocation8 + $0xc0] ss:$16 sps:$4 sm:$0xff]  }
 0x7c1   :  { %1804 = vmatpush1.bf16.msra.mxu1 %v3410_v24  ;;  %1845 = vmatpush1.bf16.msra.mxu0 %v3413_v40  ;;  %v3653_v40 = vld [vmem:[#allocation31_spill] sm:$0xff] }
 0x7c2   :  { %1805 = vmatprep.subr.bf16.mxu1 %v3416_v41  ;;  %1846 = vmatprep.subr.bf16.mxu0 %v3419_v17  ;;  %v3654_v17 = vld [vmem:[#allocation32_spill] sm:$0xff] }
 0x7c5   :  { %1806 = vmatpush1.bf16.msra.mxu1 %v3422_v26  ;;  %1847 = vmatpush1.bf16.msra.mxu0 %v3425_v27 }
 0x7c6   :  { %1807 = vmatprep.subr.bf16.mxu1 %v3428_v36  ;;  %1848 = vmatprep.subr.bf16.mxu0 %v3431_v38  ;;  %v3655_v38 = vld [vmem:[#allocation33_spill] sm:$0xff] }
 0x7c9   :  { %1808 = vmatpush1.bf16.msra.mxu1 %v3434_v48  ;;  %1849 = vmatpush1.bf16.msra.mxu0 %v3437_v16  ;;  %v3656_v16 = vld [vmem:[#allocation34_spill] sm:$0xff] }
 0x7ca   :  { %1809 = vmatprep.subr.bf16.mxu1 %v3440_v39  ;;  %1850 = vmatprep.subr.bf16.mxu0 %v3443_v44 }
 0x7cd   :  { %1810 = vmatpush1.bf16.msra.mxu1 %v3446_v47  ;;  %1851 = vmatpush1.bf16.msra.mxu0 %v3449_v57 }
 0x7ce   :  { %1811 = vmatprep.subr.bf16.mxu1 %v3452_v30  ;;  %1852 = vmatprep.subr.bf16.mxu0 %v3455_v31 }
 0x7d1   :  { %1812 = vmatpush1.bf16.msra.mxu1 %v3458_v32  ;;  %1853 = vmatpush1.bf16.msra.mxu0 %v3461_v33 }
 0x7d2   :  { %1813 = vmatprep.subr.bf16.mxu1 %v3464_v34  ;;  %1854 = vmatprep.subr.bf16.mxu0 %v3467_v35 }
 0x7d5   :  { %1814 = vmatpush1.bf16.msra.mxu1 %v2624_v25  ;;  %1855 = vmatpush1.bf16.msra.mxu0 %v2625_v2  ;;  %v3659_v25 = vld [vmem:[#allocation37_spill] sm:$0xff] }
 0x7d6   :  { %1815 = vmatprep.subr.bf16.mxu1 %v2626_v62  ;;  %1856 = vmatprep.subr.bf16.mxu0 %v2627_v20  ;;  %v3660_v62 = vld [vmem:[#allocation38_spill] sm:$0xff] }
 0x7d9   :  { %1816 = vmatpush1.bf16.msra.mxu1 %v2628_v9  ;;  %1857 = vmatpush1.bf16.msra.mxu0 %v2629_v18 }
 0x7da   :  { %2322 = vmatprep.subr.bf16.mxu1 %v2759_v55  ;;  %2342 = vmatprep.subr.bf16.mxu0 %v2759_v55 }
 0x88f   :  { %v1723_v23 = vpop.f32.mrb[40].mxu1  ;;  %v1764_v24 = vpop.f32.mrb[56].mxu0 }
 0x890   :  { %v1771_v41 = vadd.f32 %v1723_v23, %v3653_v40  ;;  %v1773_v26 = vadd.f32 %v1764_v24, %v3654_v17  ;;  %v1725_v27 = vpop.f32.mrb[41].mxu1  ;;  %v1766_v36 = vpop.f32.mrb[57].mxu0 }
 0x891   :  { %v1772_v48 = vadd.f32 %v1725_v27, %v3655_v38  ;;  %v1774_v39 = vadd.f32 %v1766_v36, %v3656_v16  ;;  %v1727_v44 = vpop.f32.mrb[42].mxu1  ;;  %v1768_v47 = vpop.f32.mrb[58].mxu0 }
 0x892   :  { %v1775_v57 = vmul.f32 0.5, %v1771_v41  ;;  %v1728_v30 = vpop.f32.mrb[43].mxu1  ;;  %v1769_v31 = vpop.f32.mrb[59].mxu0 }
 0x893   :  { %v1779_v32 = vmul.f32 0.5, %v1772_v48  ;;  %v1784_v33 = vmul.f32 0.5, %v1774_v39 }
 0x894   :  { %2576 = vtanh.f32 %v1775_v57 }
 0x895   :  { %2578 = vtanh.f32 %v1779_v32 }
 0x896   :  { %2580 = vtanh.f32 %v1773_v26 }
 0x897   :  { %2582 = vtanh.f32 %v1784_v33 }
 0x89e   :  { %v2577_v34 = vpop.eup %2576 }
 0x89f   :  { %v2579_v35 = vpop.eup %2578  ;;  %v1777_v42 = vmul.f32 0.5, %v2577_v34 }
 0x8a0   :  { %v1781_v43 = vmul.f32 0.5, %v2579_v35  ;;  %v2581_v46 = vpop.eup %2580 }
 0x8a1   :  { %v1778_v45 = vadd.f32 0.5, %v1777_v42  ;;  %v2583_v51 = vpop.eup %2582 }
 0x8a2   :  { %v1782_v49 = vadd.f32 0.5, %v1781_v43  ;;  %v1786_v7 = vmul.f32 0.5, %v2583_v51  ;;  %v2512_v43 = vld [vmem:[#allocation9 + $0x20] sm:$0xff]  }
 0x8a3   :  { %v1789_v5 = vmul.f32 %v2581_v46, %v1778_v45  ;;  %v2513_v45 = vld [vmem:[#allocation9 + $0x28] sm:$0xff]   ;;  %v2514_v46 = vld [vmem:[#allocation9 + $0x30] sm:$0xff]  }
 0x8a4   :  { %v1788_v50 = vmul.f32 %v1782_v49, %v3483_v1  ;;  %v1787_v52 = vadd.f32 0.5, %v1786_v7  ;;  %v2515_v49 = vld [vmem:[#allocation9 + $0x38] sm:$0xff]  }
 0x8a6   :  { %v3521_v6 = vadd.f32 %v1789_v5, %v1788_v50 }
 0x8a8   :  { %2584 = vtanh.f32 %v3521_v6 }
 0x8b2   :  { %v2585_v8 = vpop.eup %2584 }
 0x8b3   :  { %v1792_v53 = vmul.f32 %v2585_v8, %v1787_v52 }
 0x8b5   :  { %v1800_v11 = vpack.c.bf16 %v1792_v53, %v1792_v53  ;;  %v3526_v54 = vsel %vm1793_vm15, %v1792_v53, %v3488_v21  ;;  %v2255_v53 = vld [vmem:[%s3604_s9] ss:$0 sm:$0xff] }
 0x8b7   :  { %1834 = vmatmul.mubr.bf16.vlgmr.msra.gmra.mrb[44].mxu1 %v1800_v11  ;;  %1875 = vmatmul.mubr.bf16.vlgmr.msra.gmra.mrb[60].mxu0 %v1800_v11 }
 0x8b8   :  { %2323 = vmatpush3.bf16.msra.mxu1 %v2500_v12  ;;  %2338 = vmatprep.mubr.msk.bf16.mxu1 %vm2760_vm1, %v2759_v55 }
 0x8b9   :  { %2324 = vmatprep.subr.bf16.mxu1 %v2759_v55  ;;  %2358 = vmatprep.mubr.msk.bf16.mxu0 %vm2760_vm1, %v2759_v55 }
 0x8ba   :  { %2343 = vmatpush3.bf16.msra.mxu0 %v2508_v61 }
 0x8bb   :  { %2344 = vmatprep.subr.bf16.mxu0 %v2759_v55 }
 0x8bc   :  { %2325 = vmatpush3.bf16.msra.mxu1 %v2501_v28 }
 0x8bd   :  { %2326 = vmatprep.subr.bf16.mxu1 %v2759_v55 }
 0x8be   :  { %2345 = vmatpush3.bf16.msra.mxu0 %v2509_v37 }
 0x8bf   :  { %2346 = vmatprep.subr.bf16.mxu0 %v2759_v55 }
 0x8c0   :  { %2327 = vmatpush3.bf16.msra.mxu1 %v2502_v29 }
 0x8c1   :  { %2328 = vmatprep.subr.bf16.mxu1 %v2759_v55 }
 0x8c2   :  { %2347 = vmatpush3.bf16.msra.mxu0 %v2510_v14 }
 0x8c3   :  { %2348 = vmatprep.subr.bf16.mxu0 %v2759_v55 }
 0x8c4   :  { %2329 = vmatpush3.bf16.msra.mxu1 %v2503_v56 }
 0x8c5   :  { %2330 = vmatprep.subr.bf16.mxu1 %v2759_v55 }
 0x8c6   :  { %2349 = vmatpush3.bf16.msra.mxu0 %v2511_v58 }
 0x8c7   :  { %2350 = vmatprep.subr.bf16.mxu0 %v2759_v55 }
 0x8c8   :  { %2331 = vmatpush3.bf16.msra.mxu1 %v2504_v59 }
 0x8c9   :  { %2332 = vmatprep.subr.bf16.mxu1 %v2759_v55 }
 0x8ca   :  { %2351 = vmatpush3.bf16.msra.mxu0 %v2512_v43 }
 0x8cb   :  { %2352 = vmatprep.subr.bf16.mxu0 %v2759_v55 }
 0x8cc   :  { %2333 = vmatpush3.bf16.msra.mxu1 %v2505_v60 }
 0x8cd   :  { %2334 = vmatprep.subr.bf16.mxu1 %v2759_v55 }
 0x8ce   :  { %2353 = vmatpush3.bf16.msra.mxu0 %v2513_v45 }
 0x8cf   :  { %2354 = vmatprep.subr.bf16.mxu0 %v2759_v55 }
 0x8d0   :  { %2335 = vmatpush3.bf16.msra.mxu1 %v2506_v63 }
 0x8d1   :  { %2336 = vmatprep.subr.bf16.mxu1 %v2759_v55 }
 0x8d2   :  { %2355 = vmatpush3.bf16.msra.mxu0 %v2514_v46 }
 0x8d3   :  { %2356 = vmatprep.subr.bf16.mxu0 %v2759_v55 }
 0x8d4   :  { %2337 = vmatpush3.bf16.msra.mxu1 %v2507_v0 }
 0x8d6   :  { %2357 = vmatpush3.bf16.msra.mxu0 %v2515_v49 }
 0x98a   :  { %v1835_v1 = vpop.f32.mrb[44].mxu1  ;;  %v1876_v13 = vpop.f32.mrb[60].mxu0 }
 0x98b   :  { %v1883_v3 = vadd.f32 %v1835_v1, %v3657_v22  ;;  %v1885_v10 = vadd.f32 %v1876_v13, %v3658_v4  ;;  %v1837_v21 = vpop.f32.mrb[45].mxu1  ;;  %v1878_v19 = vpop.f32.mrb[61].mxu0 }
 0x98c   :  { %v1884_v2 = vadd.f32 %v1837_v21, %v3659_v25  ;;  %v1886_v20 = vadd.f32 %v1878_v19, %v3660_v62  ;;  %v1839_v9 = vpop.f32.mrb[46].mxu1  ;;  %v1880_v18 = vpop.f32.mrb[62].mxu0 }
 0x98d   :  { %v1887_v23 = vmul.f32 0.5, %v1883_v3  ;;  %v1840_v24 = vpop.f32.mrb[47].mxu1  ;;  %v1881_v40 = vpop.f32.mrb[63].mxu0 }
 0x98e   :  { %v1891_v41 = vmul.f32 0.5, %v1884_v2  ;;  %v1896_v17 = vmul.f32 0.5, %v1886_v20 }
 0x98f   :  { %2586 = vtanh.f32 %v1887_v23 }
 0x990   :  { %2588 = vtanh.f32 %v1891_v41 }
 0x991   :  { %2590 = vtanh.f32 %v1885_v10 }
 0x992   :  { %2592 = vtanh.f32 %v1896_v17 }
 0x999   :  { %v2587_v26 = vpop.eup %2586 }
 0x99a   :  { %v2589_v27 = vpop.eup %2588  ;;  %v1889_v36 = vmul.f32 0.5, %v2587_v26 }
 0x99b   :  { %v1893_v38 = vmul.f32 0.5, %v2589_v27  ;;  %v2591_v16 = vpop.eup %2590 }
 0x99c   :  { %v1890_v48 = vadd.f32 0.5, %v1889_v36  ;;  %v2593_v30 = vpop.eup %2592 }
 0x99d   :  { %v1894_v39 = vadd.f32 0.5, %v1893_v38  ;;  %v1898_v31 = vmul.f32 0.5, %v2593_v30 }
 0x99e   :  { %v1901_v44 = vmul.f32 %v2591_v16, %v1890_v48 }
 0x99f   :  { %v1900_v47 = vmul.f32 %v1894_v39, %v3521_v6  ;;  %v1899_v32 = vadd.f32 0.5, %v1898_v31 }
 0x9a1   :  { %v1902_v57 = vadd.f32 %v1901_v44, %v1900_v47 }
 0x9a3   :  { %2594 = vtanh.f32 %v1902_v57 }
 0x9ad   :  { %v2595_v33 = vpop.eup %2594 }
 0x9ae   :  { %v1904_v34 = vmul.f32 %v2595_v33, %v1899_v32 }
 0x9b0   :  { %v1906_v35 = vsel %vm1905_vm2, %v1904_v34, %v3526_v54 }
 0x9b1   :  { %v1907_v42 = vpack.c.bf16 %v1906_v35, %v1906_v35 }
 0x9b3   :  { %2339 = vmatmul.mubr.bf16.vlgmr.msra.gmra.mrb[48].mxu1 %v1907_v42 }
 0xa86   :  { %v2013_v5 = vpop.f32.mrb[48].mxu1 }
 0xa87   :  { %v2014_v50 = vadd.f32 %v2246_v15, %v2013_v5  ;;  %v2340_v6 = vpop.f32.mrb[49].mxu1 }
 0xa88   :  { %v2016_v51 = vpop.f32.mrb[50].mxu1 }
 0xa89   :  { %2596 = vtanh.f32 %v2014_v50  ;;  %v2341_v7 = vpop.f32.mrb[51].mxu1 }
 0xa93   :  { %v2597_v52 = vpop.eup %2596 }
 0xa94   :  { %v2020_v8 = vpack.c.bf16 %v2597_v52, %v2597_v52 }
 0xa96   :  { %2359 = vmatmul.mubr.bf16.vlgmr.msra.gmra.mrb[64].mxu0 %v2020_v8 }
 0xb69   :  { %v2126_v11 = vpop.f32.mrb[64].mxu0 }
 0xb6a   :  { %v2127_v54 = vadd.f32 %v2255_v53, %v2126_v11  ;;  %v2360_v12 = vpop.f32.mrb[65].mxu0 }
 0xb6b   :  { %v2129_v55 = vpop.f32.mrb[66].mxu0 }
 0xb6c   :  { %2132 = vst [vmem:[#allocation11] sm:$0xff] %v2127_v54  ;;  %v2361_v28 = vpop.f32.mrb[67].mxu0 }
 0xb6d   :  { %2729 = shalt.err (!%p2726_p8)
}
 0xb6e   :  { %s2730_s9 = scalar_lea.hbm %s3605_s10, 128 }
 0xb6f   :  { %p2731_p9 = scmp.ne.s32.totalorder %s3605_s10, %s2730_s9  ;;  %p2734_p10 = scmp.lt.u32.totalorder %s2730_s9, %s3605_s10 }
 0xb71   :  { %p2736_p11 = pnand %p2734_p10, %p2731_p9 }
 0xb73   :  { %2739 = shalt.err (!%p2736_p11)
}
 0xb74   :  { %2142 = dma.vmem_to_hbm [thread:$0]  %s2140_s15, 128, %s3605_s10, [#allocation5]  }
 0xb75   :  { %2746 = dma.done.wait [#allocation5], 128  }
 0xb76   :  { %2747 = vsyncadd [#allocation5], 4294967168 }
 0xb77   :  { %2146 = vsyncpa [#allocation4], 1 }
 0xb78   :  { %2147 = vsyncpa [#allocation7], 1 }
 0xb79   :  { %2148 = vsyncpa [#allocation10], 1 }
 0xb7a   :  { %2149 = vsyncpa [#allocation5], 1 }

</bundles_post_ra>
